<compile_context>
chip_gen: v6e
topology: v6e:2x2x1
jax: 0.10.0
libtpu: 0.0.40
codegen_flags: <defaults>
</compile_context>

<pallas_src>
import jax
import jax.numpy as jnp
import numpy as np
from jax import lax
from jax.experimental import pallas as pl
from jax.experimental.pallas import tpu as pltpu

VOCAB = 16        # input_size (embedding rows / token vocabulary)
HIDDEN = 32       # hidden_size
OUTPUT = 16       # output_size
NUM_LAYERS = 1
SEQ = 8           # number of forward() steps run inside one kernel

HP = 128          # hidden dim padded to a full lane group
VP = 128          # vocab dim padded (one-hot lane width)
OP = 128          # output dim padded


def gru_seq_kernel(tokens_ref,            # VMEM (SEQ, 1) int32
                   gi_tbl_ref,            # VMEM (VP, 3*HP)  = emb @ W_i + b_i, padded
                   w_h_ref,               # VMEM (HP, 3*HP)
                   b_h_ref,               # VMEM (1, 3*HP)
                   w_out_ref,             # VMEM (HP, OP)
                   b_out_ref,             # VMEM (1, OP)
                   h0_ref,                # VMEM (1, HP)
                   logits_ref,            # out VMEM (SEQ, OP)
                   h_out_ref,             # out VMEM (1, HP)
                   hs_ref):               # scratch VMEM (SEQ, HP)
    # --- All timesteps' input-gate activations in one MXU op ---------------
    lane_ids = lax.broadcasted_iota(jnp.int32, (SEQ, VP), 1)
    onehot = (lane_ids == tokens_ref[...]).astype(jnp.float32)   # (SEQ, VP)
    gi_all = jnp.dot(onehot, gi_tbl_ref[...],
                     preferred_element_type=jnp.float32)         # (SEQ, 3*HP)

    w_h = w_h_ref[...]
    b_h = b_h_ref[...]
    h = h0_ref[...]                                              # (1, HP)

    # --- Serial recurrence (short static sequence -> fully unrolled) -------
    for t in range(SEQ):
        gi = gi_all[t:t + 1, :]                                  # (1, 3*HP), static slice
        gh = jnp.dot(h, w_h,
                     preferred_element_type=jnp.float32) + b_h   # (1, 3*HP)
        # PyTorch GRU cell (gate order r, z, n):
        r = jax.nn.sigmoid(gi[:, 0:HP] + gh[:, 0:HP])
        z = jax.nn.sigmoid(gi[:, HP:2 * HP] + gh[:, HP:2 * HP])
        n = jnp.tanh(gi[:, 2 * HP:3 * HP] + r * gh[:, 2 * HP:3 * HP])
        h = (1.0 - z) * n + z * h
        hs_ref[pl.ds(t, 1), :] = h                               # static row store

    h_out_ref[...] = h
    # --- One batched output projection for all timesteps (8x128 @ 128x128) -
    logits_ref[...] = (jnp.dot(hs_ref[...], w_out_ref[...],
                               preferred_element_type=jnp.float32)
                       + b_out_ref[...])


def init_params(key):
    ks = jax.random.split(key, 15)
    bound = 1.0 / np.sqrt(HIDDEN)

    def u(k, shape):
        return jax.random.uniform(k, shape, jnp.float32, -bound, bound)

    return dict(
        emb=jax.random.normal(ks[0], (VOCAB, HIDDEN), jnp.float32),
        # GRU weights stored transposed: (in, out)
        w_ir=u(ks[1], (HIDDEN, HIDDEN)), w_iz=u(ks[2], (HIDDEN, HIDDEN)),
        w_in=u(ks[3], (HIDDEN, HIDDEN)),
        w_hr=u(ks[4], (HIDDEN, HIDDEN)), w_hz=u(ks[5], (HIDDEN, HIDDEN)),
        w_hn=u(ks[6], (HIDDEN, HIDDEN)),
        b_ir=u(ks[7], (1, HIDDEN)), b_iz=u(ks[8], (1, HIDDEN)),
        b_in=u(ks[9], (1, HIDDEN)),
        b_hr=u(ks[10], (1, HIDDEN)), b_hz=u(ks[11], (1, HIDDEN)),
        b_hn=u(ks[12], (1, HIDDEN)),
        # Output linear, stored transposed: (H, O)
        w_out=u(ks[13], (HIDDEN, OUTPUT)),
        b_out=u(ks[14], (1, OUTPUT)),
    )


def pack_params(p):
    """Fuse + lane-pad weights once, outside the kernel.

    Gate g lives in lanes [g*HP, g*HP + HIDDEN); all padding is zeros, so
    padded lanes/rows never perturb the real hidden state or logits."""
    w_i = jnp.concatenate([p["w_ir"], p["w_iz"], p["w_in"]], axis=1)   # (H, 3H)
    b_i = jnp.concatenate([p["b_ir"], p["b_iz"], p["b_in"]], axis=1)   # (1, 3H)
    gi_real = p["emb"] @ w_i + b_i                                     # (VOCAB, 3H)

    gi_tbl = jnp.zeros((VP, 3 * HP), jnp.float32)
    w_h = jnp.zeros((HP, 3 * HP), jnp.float32)
    b_h = jnp.zeros((1, 3 * HP), jnp.float32)
    hh = [(p["w_hr"], p["b_hr"]), (p["w_hz"], p["b_hz"]), (p["w_hn"], p["b_hn"])]
    for g, (wg, bg) in enumerate(hh):
        c0 = g * HP
        gi_tbl = gi_tbl.at[:VOCAB, c0:c0 + HIDDEN].set(
            gi_real[:, g * HIDDEN:(g + 1) * HIDDEN])
        w_h = w_h.at[:HIDDEN, c0:c0 + HIDDEN].set(wg)
        b_h = b_h.at[:, c0:c0 + HIDDEN].set(bg)

    w_out = jnp.zeros((HP, OP), jnp.float32).at[:HIDDEN, :OUTPUT].set(p["w_out"])
    b_out = jnp.zeros((1, OP), jnp.float32).at[:, :OUTPUT].set(p["b_out"])
    return dict(gi_tbl=gi_tbl, w_h=w_h, b_h=b_h, w_out=w_out, b_out=b_out)


def our_model_forward_seq(tokens, hidden, packed):
    """tokens: int32 (SEQ,); hidden: float32 (NUM_LAYERS, 1, HIDDEN).
    Runs OurModel.forward over the whole token sequence inside one kernel.
    Returns (outputs (SEQ, OUTPUT), final hidden (NUM_LAYERS, 1, HIDDEN))."""
    h0 = jnp.zeros((1, HP), jnp.float32).at[:, :HIDDEN].set(
        hidden.reshape(1, HIDDEN))
    tokens_col = tokens.astype(jnp.int32).reshape(SEQ, 1)

    vmem = pl.BlockSpec(memory_space=pltpu.MemorySpace.VMEM)

    logits_p, h_p = pl.pallas_call(
        gru_seq_kernel,
        out_shape=(jax.ShapeDtypeStruct((SEQ, OP), jnp.float32),
                   jax.ShapeDtypeStruct((1, HP), jnp.float32)),
        in_specs=[vmem] * 7,
        out_specs=(vmem, vmem),
        scratch_shapes=[pltpu.VMEM((SEQ, HP), jnp.float32)],
    )(tokens_col, packed["gi_tbl"], packed["w_h"], packed["b_h"],
      packed["w_out"], packed["b_out"], h0)

    return logits_p[:, :OUTPUT], h_p[:, :HIDDEN].reshape(NUM_LAYERS, 1, HIDDEN)


def ref_forward_seq(tokens, hidden, p):
    """Pure-JAX reference: OurModel.forward applied step by step."""
    h = hidden.reshape(1, HIDDEN)
    outs = []
    for t in range(tokens.shape[0]):
        x = p["emb"][tokens[t]][None, :]                       # (1, H)
        r = jax.nn.sigmoid(x @ p["w_ir"] + p["b_ir"] + h @ p["w_hr"] + p["b_hr"])
        z = jax.nn.sigmoid(x @ p["w_iz"] + p["b_iz"] + h @ p["w_hz"] + p["b_hz"])
        n = jnp.tanh(x @ p["w_in"] + p["b_in"] + r * (h @ p["w_hn"] + p["b_hn"]))
        h = (1.0 - z) * n + z * h
        outs.append(h @ p["w_out"] + p["b_out"])
    return jnp.concatenate(outs, axis=0), h.reshape(NUM_LAYERS, 1, HIDDEN)


if __name__ == "__main__":
    key = jax.random.PRNGKey(0)
    pkey, tkey = jax.random.split(key)
    params = init_params(pkey)
    packed = pack_params(params)

    # Deterministic example input: SEQ token indices, zero-initialized hidden
    # (matches OurModel.init_hidden()).
    tokens = jax.random.randint(tkey, (SEQ,), 0, VOCAB, dtype=jnp.int32)
    hidden0 = jnp.zeros((NUM_LAYERS, 1, HIDDEN), jnp.float32)

    out, h_new = our_model_forward_seq(tokens, hidden0, packed)
    out = jax.block_until_ready(out)
    h_new = jax.block_until_ready(h_new)

    out_ref, h_ref = ref_forward_seq(tokens, hidden0, params)
    np.testing.assert_allclose(np.asarray(out), np.asarray(out_ref),
                               rtol=2e-5, atol=2e-5)
    np.testing.assert_allclose(np.asarray(h_new), np.asarray(h_ref),
                               rtol=2e-5, atol=2e-5)

    print("KERNEL_OK")
</pallas_src>

<mosaic_0001>
module attributes {stable_mosaic.version = 11 : i64} {
  func.func @gru_seq_kernel(%arg0: memref<8x1xi32, #tpu.memory_space<vmem>>, %arg1: memref<128x384xf32, #tpu.memory_space<vmem>>, %arg2: memref<128x384xf32, #tpu.memory_space<vmem>>, %arg3: memref<1x384xf32, #tpu.memory_space<vmem>>, %arg4: memref<128x128xf32, #tpu.memory_space<vmem>>, %arg5: memref<1x128xf32, #tpu.memory_space<vmem>>, %arg6: memref<1x128xf32, #tpu.memory_space<vmem>>, %arg7: memref<8x128xf32, #tpu.memory_space<vmem>>, %arg8: memref<1x128xf32, #tpu.memory_space<vmem>>, %arg9: memref<8x128xf32, #tpu.memory_space<vmem>>) attributes {dimension_semantics = [], scalar_prefetch = 0 : i64, scratch_operands = 1 : i64, tpu.core_type = #tpu.core_type<tc>} {
    %0 = tpu.iota {dimensions = array<i32: 1>} : vector<8x128xi32>
    %c0 = arith.constant 0 : index
    %c0_0 = arith.constant 0 : index
    %1 = vector.load %arg0[%c0, %c0_0] : memref<8x1xi32, #tpu.memory_space<vmem>>, vector<8x1xi32>
    %2 = vector.broadcast %1 : vector<8x1xi32> to vector<8x128xi32>
    %3 = arith.cmpi eq, %0, %2 : vector<8x128xi32>
    %4 = arith.extui %3 : vector<8x128xi1> to vector<8x128xi32>
    %5 = arith.sitofp %4 : vector<8x128xi32> to vector<8x128xf32>
    %c0_1 = arith.constant 0 : index
    %c0_2 = arith.constant 0 : index
    %6 = vector.load %arg1[%c0_1, %c0_2] : memref<128x384xf32, #tpu.memory_space<vmem>>, vector<128x384xf32>
    %cst = arith.constant dense<0.000000e+00> : vector<8x384xf32>
    %7 = tpu.matmul %5, %6, %cst {dimension_numbers = #tpu.dot_dimension_numbers<[1], [0], [0], [1], [0, 0, 1, 1], [], []>} : vector<8x128xf32>, vector<128x384xf32>, vector<8x384xf32> -> vector<8x384xf32>
    %c0_3 = arith.constant 0 : index
    %c0_4 = arith.constant 0 : index
    %8 = vector.load %arg2[%c0_3, %c0_4] : memref<128x384xf32, #tpu.memory_space<vmem>>, vector<128x384xf32>
    %c0_5 = arith.constant 0 : index
    %c0_6 = arith.constant 0 : index
    %9 = vector.load %arg3[%c0_5, %c0_6] : memref<1x384xf32, #tpu.memory_space<vmem>>, vector<1x384xf32>
    %c0_7 = arith.constant 0 : index
    %c0_8 = arith.constant 0 : index
    %10 = vector.load %arg6[%c0_7, %c0_8] : memref<1x128xf32, #tpu.memory_space<vmem>>, vector<1x128xf32>
    %11 = vector.extract_strided_slice %7 {offsets = [0, 0], sizes = [1, 384], strides = [1, 1]} : vector<8x384xf32> to vector<1x384xf32>
    %cst_9 = arith.constant dense<0.000000e+00> : vector<1x384xf32>
    %12 = tpu.matmul %10, %8, %cst_9 {dimension_numbers = #tpu.dot_dimension_numbers<[1], [0], [0], [1], [0, 0, 1, 1], [], []>} : vector<1x128xf32>, vector<128x384xf32>, vector<1x384xf32> -> vector<1x384xf32>
    %13 = arith.addf %12, %9 : vector<1x384xf32>
    %14 = vector.extract_strided_slice %11 {offsets = [0, 0], sizes = [1, 128], strides = [1, 1]} : vector<1x384xf32> to vector<1x128xf32>
    %15 = vector.extract_strided_slice %13 {offsets = [0, 0], sizes = [1, 128], strides = [1, 1]} : vector<1x384xf32> to vector<1x128xf32>
    %16 = arith.addf %14, %15 : vector<1x128xf32>
    %17 = arith.negf %16 : vector<1x128xf32>
    %18 = math.exp %17 : vector<1x128xf32>
    %cst_10 = arith.constant 1.000000e+00 : f32
    %19 = vector.broadcast %cst_10 : f32 to vector<1x128xf32>
    %20 = arith.addf %19, %18 : vector<1x128xf32>
    %21 = arith.divf %19, %20 : vector<1x128xf32>
    %22 = vector.extract_strided_slice %11 {offsets = [0, 128], sizes = [1, 128], strides = [1, 1]} : vector<1x384xf32> to vector<1x128xf32>
    %23 = vector.extract_strided_slice %13 {offsets = [0, 128], sizes = [1, 128], strides = [1, 1]} : vector<1x384xf32> to vector<1x128xf32>
    %24 = arith.addf %22, %23 : vector<1x128xf32>
    %25 = arith.negf %24 : vector<1x128xf32>
    %26 = math.exp %25 : vector<1x128xf32>
    %cst_11 = arith.constant 1.000000e+00 : f32
    %27 = vector.broadcast %cst_11 : f32 to vector<1x128xf32>
    %28 = arith.addf %27, %26 : vector<1x128xf32>
    %29 = arith.divf %27, %28 : vector<1x128xf32>
    %30 = vector.extract_strided_slice %11 {offsets = [0, 256], sizes = [1, 128], strides = [1, 1]} : vector<1x384xf32> to vector<1x128xf32>
    %31 = vector.extract_strided_slice %13 {offsets = [0, 256], sizes = [1, 128], strides = [1, 1]} : vector<1x384xf32> to vector<1x128xf32>
    %32 = arith.mulf %21, %31 : vector<1x128xf32>
    %33 = arith.addf %30, %32 : vector<1x128xf32>
    %34 = math.tanh %33 : vector<1x128xf32>
    %cst_12 = arith.constant 1.000000e+00 : f32
    %35 = vector.broadcast %cst_12 : f32 to vector<1x128xf32>
    %36 = arith.subf %35, %29 : vector<1x128xf32>
    %37 = arith.mulf %36, %34 : vector<1x128xf32>
    %38 = arith.mulf %29, %10 : vector<1x128xf32>
    %39 = arith.addf %37, %38 : vector<1x128xf32>
    %c0_13 = arith.constant 0 : index
    %c0_14 = arith.constant 0 : index
    %40 = vector.load %arg9[%c0_13, %c0_14] : memref<8x128xf32, #tpu.memory_space<vmem>>, vector<1x128xf32>
    tpu.vector_store %arg9[%c0_13, %c0_14], %39 {strides = array<i32>} : memref<8x128xf32, #tpu.memory_space<vmem>>, vector<1x128xf32>,
    %41 = vector.extract_strided_slice %7 {offsets = [1, 0], sizes = [1, 384], strides = [1, 1]} : vector<8x384xf32> to vector<1x384xf32>
    %cst_15 = arith.constant dense<0.000000e+00> : vector<1x384xf32>
    %42 = tpu.matmul %39, %8, %cst_15 {dimension_numbers = #tpu.dot_dimension_numbers<[1], [0], [0], [1], [0, 0, 1, 1], [], []>} : vector<1x128xf32>, vector<128x384xf32>, vector<1x384xf32> -> vector<1x384xf32>
    %43 = arith.addf %42, %9 : vector<1x384xf32>
    %44 = vector.extract_strided_slice %41 {offsets = [0, 0], sizes = [1, 128], strides = [1, 1]} : vector<1x384xf32> to vector<1x128xf32>
    %45 = vector.extract_strided_slice %43 {offsets = [0, 0], sizes = [1, 128], strides = [1, 1]} : vector<1x384xf32> to vector<1x128xf32>
    %46 = arith.addf %44, %45 : vector<1x128xf32>
    %47 = arith.negf %46 : vector<1x128xf32>
    %48 = math.exp %47 : vector<1x128xf32>
    %cst_16 = arith.constant 1.000000e+00 : f32
    %49 = vector.broadcast %cst_16 : f32 to vector<1x128xf32>
    %50 = arith.addf %49, %48 : vector<1x128xf32>
    %51 = arith.divf %49, %50 : vector<1x128xf32>
    %52 = vector.extract_strided_slice %41 {offsets = [0, 128], sizes = [1, 128], strides = [1, 1]} : vector<1x384xf32> to vector<1x128xf32>
    %53 = vector.extract_strided_slice %43 {offsets = [0, 128], sizes = [1, 128], strides = [1, 1]} : vector<1x384xf32> to vector<1x128xf32>
    %54 = arith.addf %52, %53 : vector<1x128xf32>
    %55 = arith.negf %54 : vector<1x128xf32>
    %56 = math.exp %55 : vector<1x128xf32>
    %cst_17 = arith.constant 1.000000e+00 : f32
    %57 = vector.broadcast %cst_17 : f32 to vector<1x128xf32>
    %58 = arith.addf %57, %56 : vector<1x128xf32>
    %59 = arith.divf %57, %58 : vector<1x128xf32>
    %60 = vector.extract_strided_slice %41 {offsets = [0, 256], sizes = [1, 128], strides = [1, 1]} : vector<1x384xf32> to vector<1x128xf32>
    %61 = vector.extract_strided_slice %43 {offsets = [0, 256], sizes = [1, 128], strides = [1, 1]} : vector<1x384xf32> to vector<1x128xf32>
    %62 = arith.mulf %51, %61 : vector<1x128xf32>
    %63 = arith.addf %60, %62 : vector<1x128xf32>
    %64 = math.tanh %63 : vector<1x128xf32>
    %cst_18 = arith.constant 1.000000e+00 : f32
    %65 = vector.broadcast %cst_18 : f32 to vector<1x128xf32>
    %66 = arith.subf %65, %59 : vector<1x128xf32>
    %67 = arith.mulf %66, %64 : vector<1x128xf32>
    %68 = arith.mulf %59, %39 : vector<1x128xf32>
    %69 = arith.addf %67, %68 : vector<1x128xf32>
    %c1 = arith.constant 1 : index
    %c0_19 = arith.constant 0 : index
    %70 = vector.load %arg9[%c1, %c0_19] : memref<8x128xf32, #tpu.memory_space<vmem>>, vector<1x128xf32>
    tpu.vector_store %arg9[%c1, %c0_19], %69 {strides = array<i32>} : memref<8x128xf32, #tpu.memory_space<vmem>>, vector<1x128xf32>,
    %71 = vector.extract_strided_slice %7 {offsets = [2, 0], sizes = [1, 384], strides = [1, 1]} : vector<8x384xf32> to vector<1x384xf32>
    %cst_20 = arith.constant dense<0.000000e+00> : vector<1x384xf32>
    %72 = tpu.matmul %69, %8, %cst_20 {dimension_numbers = #tpu.dot_dimension_numbers<[1], [0], [0], [1], [0, 0, 1, 1], [], []>} : vector<1x128xf32>, vector<128x384xf32>, vector<1x384xf32> -> vector<1x384xf32>
    %73 = arith.addf %72, %9 : vector<1x384xf32>
    %74 = vector.extract_strided_slice %71 {offsets = [0, 0], sizes = [1, 128], strides = [1, 1]} : vector<1x384xf32> to vector<1x128xf32>
    %75 = vector.extract_strided_slice %73 {offsets = [0, 0], sizes = [1, 128], strides = [1, 1]} : vector<1x384xf32> to vector<1x128xf32>
    %76 = arith.addf %74, %75 : vector<1x128xf32>
    %77 = arith.negf %76 : vector<1x128xf32>
    %78 = math.exp %77 : vector<1x128xf32>
    %cst_21 = arith.constant 1.000000e+00 : f32
    %79 = vector.broadcast %cst_21 : f32 to vector<1x128xf32>
    %80 = arith.addf %79, %78 : vector<1x128xf32>
    %81 = arith.divf %79, %80 : vector<1x128xf32>
    %82 = vector.extract_strided_slice %71 {offsets = [0, 128], sizes = [1, 128], strides = [1, 1]} : vector<1x384xf32> to vector<1x128xf32>
    %83 = vector.extract_strided_slice %73 {offsets = [0, 128], sizes = [1, 128], strides = [1, 1]} : vector<1x384xf32> to vector<1x128xf32>
    %84 = arith.addf %82, %83 : vector<1x128xf32>
    %85 = arith.negf %84 : vector<1x128xf32>
    %86 = math.exp %85 : vector<1x128xf32>
    %cst_22 = arith.constant 1.000000e+00 : f32
    %87 = vector.broadcast %cst_22 : f32 to vector<1x128xf32>
    %88 = arith.addf %87, %86 : vector<1x128xf32>
    %89 = arith.divf %87, %88 : vector<1x128xf32>
    %90 = vector.extract_strided_slice %71 {offsets = [0, 256], sizes = [1, 128], strides = [1, 1]} : vector<1x384xf32> to vector<1x128xf32>
    %91 = vector.extract_strided_slice %73 {offsets = [0, 256], sizes = [1, 128], strides = [1, 1]} : vector<1x384xf32> to vector<1x128xf32>
    %92 = arith.mulf %81, %91 : vector<1x128xf32>
    %93 = arith.addf %90, %92 : vector<1x128xf32>
    %94 = math.tanh %93 : vector<1x128xf32>
    %cst_23 = arith.constant 1.000000e+00 : f32
    %95 = vector.broadcast %cst_23 : f32 to vector<1x128xf32>
    %96 = arith.subf %95, %89 : vector<1x128xf32>
    %97 = arith.mulf %96, %94 : vector<1x128xf32>
    %98 = arith.mulf %89, %69 : vector<1x128xf32>
    %99 = arith.addf %97, %98 : vector<1x128xf32>
    %c2 = arith.constant 2 : index
    %c0_24 = arith.constant 0 : index
    %100 = vector.load %arg9[%c2, %c0_24] : memref<8x128xf32, #tpu.memory_space<vmem>>, vector<1x128xf32>
    tpu.vector_store %arg9[%c2, %c0_24], %99 {strides = array<i32>} : memref<8x128xf32, #tpu.memory_space<vmem>>, vector<1x128xf32>,
    %101 = vector.extract_strided_slice %7 {offsets = [3, 0], sizes = [1, 384], strides = [1, 1]} : vector<8x384xf32> to vector<1x384xf32>
    %cst_25 = arith.constant dense<0.000000e+00> : vector<1x384xf32>
    %102 = tpu.matmul %99, %8, %cst_25 {dimension_numbers = #tpu.dot_dimension_numbers<[1], [0], [0], [1], [0, 0, 1, 1], [], []>} : vector<1x128xf32>, vector<128x384xf32>, vector<1x384xf32> -> vector<1x384xf32>
    %103 = arith.addf %102, %9 : vector<1x384xf32>
    %104 = vector.extract_strided_slice %101 {offsets = [0, 0], sizes = [1, 128], strides = [1, 1]} : vector<1x384xf32> to vector<1x128xf32>
    %105 = vector.extract_strided_slice %103 {offsets = [0, 0], sizes = [1, 128], strides = [1, 1]} : vector<1x384xf32> to vector<1x128xf32>
    %106 = arith.addf %104, %105 : vector<1x128xf32>
    %107 = arith.negf %106 : vector<1x128xf32>
    %108 = math.exp %107 : vector<1x128xf32>
    %cst_26 = arith.constant 1.000000e+00 : f32
    %109 = vector.broadcast %cst_26 : f32 to vector<1x128xf32>
    %110 = arith.addf %109, %108 : vector<1x128xf32>
    %111 = arith.divf %109, %110 : vector<1x128xf32>
    %112 = vector.extract_strided_slice %101 {offsets = [0, 128], sizes = [1, 128], strides = [1, 1]} : vector<1x384xf32> to vector<1x128xf32>
    %113 = vector.extract_strided_slice %103 {offsets = [0, 128], sizes = [1, 128], strides = [1, 1]} : vector<1x384xf32> to vector<1x128xf32>
    %114 = arith.addf %112, %113 : vector<1x128xf32>
    %115 = arith.negf %114 : vector<1x128xf32>
    %116 = math.exp %115 : vector<1x128xf32>
    %cst_27 = arith.constant 1.000000e+00 : f32
    %117 = vector.broadcast %cst_27 : f32 to vector<1x128xf32>
    %118 = arith.addf %117, %116 : vector<1x128xf32>
    %119 = arith.divf %117, %118 : vector<1x128xf32>
    %120 = vector.extract_strided_slice %101 {offsets = [0, 256], sizes = [1, 128], strides = [1, 1]} : vector<1x384xf32> to vector<1x128xf32>
    %121 = vector.extract_strided_slice %103 {offsets = [0, 256], sizes = [1, 128], strides = [1, 1]} : vector<1x384xf32> to vector<1x128xf32>
    %122 = arith.mulf %111, %121 : vector<1x128xf32>
    %123 = arith.addf %120, %122 : vector<1x128xf32>
    %124 = math.tanh %123 : vector<1x128xf32>
    %cst_28 = arith.constant 1.000000e+00 : f32
    %125 = vector.broadcast %cst_28 : f32 to vector<1x128xf32>
    %126 = arith.subf %125, %119 : vector<1x128xf32>
    %127 = arith.mulf %126, %124 : vector<1x128xf32>
    %128 = arith.mulf %119, %99 : vector<1x128xf32>
    %129 = arith.addf %127, %128 : vector<1x128xf32>
    %c3 = arith.constant 3 : index
    %c0_29 = arith.constant 0 : index
    %130 = vector.load %arg9[%c3, %c0_29] : memref<8x128xf32, #tpu.memory_space<vmem>>, vector<1x128xf32>
    tpu.vector_store %arg9[%c3, %c0_29], %129 {strides = array<i32>} : memref<8x128xf32, #tpu.memory_space<vmem>>, vector<1x128xf32>,
    %131 = vector.extract_strided_slice %7 {offsets = [4, 0], sizes = [1, 384], strides = [1, 1]} : vector<8x384xf32> to vector<1x384xf32>
    %cst_30 = arith.constant dense<0.000000e+00> : vector<1x384xf32>
    %132 = tpu.matmul %129, %8, %cst_30 {dimension_numbers = #tpu.dot_dimension_numbers<[1], [0], [0], [1], [0, 0, 1, 1], [], []>} : vector<1x128xf32>, vector<128x384xf32>, vector<1x384xf32> -> vector<1x384xf32>
    %133 = arith.addf %132, %9 : vector<1x384xf32>
    %134 = vector.extract_strided_slice %131 {offsets = [0, 0], sizes = [1, 128], strides = [1, 1]} : vector<1x384xf32> to vector<1x128xf32>
    %135 = vector.extract_strided_slice %133 {offsets = [0, 0], sizes = [1, 128], strides = [1, 1]} : vector<1x384xf32> to vector<1x128xf32>
    %136 = arith.addf %134, %135 : vector<1x128xf32>
    %137 = arith.negf %136 : vector<1x128xf32>
    %138 = math.exp %137 : vector<1x128xf32>
    %cst_31 = arith.constant 1.000000e+00 : f32
    %139 = vector.broadcast %cst_31 : f32 to vector<1x128xf32>
    %140 = arith.addf %139, %138 : vector<1x128xf32>
    %141 = arith.divf %139, %140 : vector<1x128xf32>
    %142 = vector.extract_strided_slice %131 {offsets = [0, 128], sizes = [1, 128], strides = [1, 1]} : vector<1x384xf32> to vector<1x128xf32>
    %143 = vector.extract_strided_slice %133 {offsets = [0, 128], sizes = [1, 128], strides = [1, 1]} : vector<1x384xf32> to vector<1x128xf32>
    %144 = arith.addf %142, %143 : vector<1x128xf32>
    %145 = arith.negf %144 : vector<1x128xf32>
    %146 = math.exp %145 : vector<1x128xf32>
    %cst_32 = arith.constant 1.000000e+00 : f32
    %147 = vector.broadcast %cst_32 : f32 to vector<1x128xf32>
    %148 = arith.addf %147, %146 : vector<1x128xf32>
    %149 = arith.divf %147, %148 : vector<1x128xf32>
    %150 = vector.extract_strided_slice %131 {offsets = [0, 256], sizes = [1, 128], strides = [1, 1]} : vector<1x384xf32> to vector<1x128xf32>
    %151 = vector.extract_strided_slice %133 {offsets = [0, 256], sizes = [1, 128], strides = [1, 1]} : vector<1x384xf32> to vector<1x128xf32>
    %152 = arith.mulf %141, %151 : vector<1x128xf32>
    %153 = arith.addf %150, %152 : vector<1x128xf32>
    %154 = math.tanh %153 : vector<1x128xf32>
    %cst_33 = arith.constant 1.000000e+00 : f32
    %155 = vector.broadcast %cst_33 : f32 to vector<1x128xf32>
    %156 = arith.subf %155, %149 : vector<1x128xf32>
    %157 = arith.mulf %156, %154 : vector<1x128xf32>
    %158 = arith.mulf %149, %129 : vector<1x128xf32>
    %159 = arith.addf %157, %158 : vector<1x128xf32>
    %c4 = arith.constant 4 : index
    %c0_34 = arith.constant 0 : index
    %160 = vector.load %arg9[%c4, %c0_34] : memref<8x128xf32, #tpu.memory_space<vmem>>, vector<1x128xf32>
    tpu.vector_store %arg9[%c4, %c0_34], %159 {strides = array<i32>} : memref<8x128xf32, #tpu.memory_space<vmem>>, vector<1x128xf32>,
    %161 = vector.extract_strided_slice %7 {offsets = [5, 0], sizes = [1, 384], strides = [1, 1]} : vector<8x384xf32> to vector<1x384xf32>
    %cst_35 = arith.constant dense<0.000000e+00> : vector<1x384xf32>
    %162 = tpu.matmul %159, %8, %cst_35 {dimension_numbers = #tpu.dot_dimension_numbers<[1], [0], [0], [1], [0, 0, 1, 1], [], []>} : vector<1x128xf32>, vector<128x384xf32>, vector<1x384xf32> -> vector<1x384xf32>
    %163 = arith.addf %162, %9 : vector<1x384xf32>
    %164 = vector.extract_strided_slice %161 {offsets = [0, 0], sizes = [1, 128], strides = [1, 1]} : vector<1x384xf32> to vector<1x128xf32>
    %165 = vector.extract_strided_slice %163 {offsets = [0, 0], sizes = [1, 128], strides = [1, 1]} : vector<1x384xf32> to vector<1x128xf32>
    %166 = arith.addf %164, %165 : vector<1x128xf32>
    %167 = arith.negf %166 : vector<1x128xf32>
    %168 = math.exp %167 : vector<1x128xf32>
    %cst_36 = arith.constant 1.000000e+00 : f32
    %169 = vector.broadcast %cst_36 : f32 to vector<1x128xf32>
    %170 = arith.addf %169, %168 : vector<1x128xf32>
    %171 = arith.divf %169, %170 : vector<1x128xf32>
    %172 = vector.extract_strided_slice %161 {offsets = [0, 128], sizes = [1, 128], strides = [1, 1]} : vector<1x384xf32> to vector<1x128xf32>
    %173 = vector.extract_strided_slice %163 {offsets = [0, 128], sizes = [1, 128], strides = [1, 1]} : vector<1x384xf32> to vector<1x128xf32>
    %174 = arith.addf %172, %173 : vector<1x128xf32>
    %175 = arith.negf %174 : vector<1x128xf32>
    %176 = math.exp %175 : vector<1x128xf32>
    %cst_37 = arith.constant 1.000000e+00 : f32
    %177 = vector.broadcast %cst_37 : f32 to vector<1x128xf32>
    %178 = arith.addf %177, %176 : vector<1x128xf32>
    %179 = arith.divf %177, %178 : vector<1x128xf32>
    %180 = vector.extract_strided_slice %161 {offsets = [0, 256], sizes = [1, 128], strides = [1, 1]} : vector<1x384xf32> to vector<1x128xf32>
    %181 = vector.extract_strided_slice %163 {offsets = [0, 256], sizes = [1, 128], strides = [1, 1]} : vector<1x384xf32> to vector<1x128xf32>
    %182 = arith.mulf %171, %181 : vector<1x128xf32>
    %183 = arith.addf %180, %182 : vector<1x128xf32>
    %184 = math.tanh %183 : vector<1x128xf32>
    %cst_38 = arith.constant 1.000000e+00 : f32
    %185 = vector.broadcast %cst_38 : f32 to vector<1x128xf32>
    %186 = arith.subf %185, %179 : vector<1x128xf32>
    %187 = arith.mulf %186, %184 : vector<1x128xf32>
    %188 = arith.mulf %179, %159 : vector<1x128xf32>
    %189 = arith.addf %187, %188 : vector<1x128xf32>
    %c5 = arith.constant 5 : index
    %c0_39 = arith.constant 0 : index
    %190 = vector.load %arg9[%c5, %c0_39] : memref<8x128xf32, #tpu.memory_space<vmem>>, vector<1x128xf32>
    tpu.vector_store %arg9[%c5, %c0_39], %189 {strides = array<i32>} : memref<8x128xf32, #tpu.memory_space<vmem>>, vector<1x128xf32>,
    %191 = vector.extract_strided_slice %7 {offsets = [6, 0], sizes = [1, 384], strides = [1, 1]} : vector<8x384xf32> to vector<1x384xf32>
    %cst_40 = arith.constant dense<0.000000e+00> : vector<1x384xf32>
    %192 = tpu.matmul %189, %8, %cst_40 {dimension_numbers = #tpu.dot_dimension_numbers<[1], [0], [0], [1], [0, 0, 1, 1], [], []>} : vector<1x128xf32>, vector<128x384xf32>, vector<1x384xf32> -> vector<1x384xf32>
    %193 = arith.addf %192, %9 : vector<1x384xf32>
    %194 = vector.extract_strided_slice %191 {offsets = [0, 0], sizes = [1, 128], strides = [1, 1]} : vector<1x384xf32> to vector<1x128xf32>
    %195 = vector.extract_strided_slice %193 {offsets = [0, 0], sizes = [1, 128], strides = [1, 1]} : vector<1x384xf32> to vector<1x128xf32>
    %196 = arith.addf %194, %195 : vector<1x128xf32>
    %197 = arith.negf %196 : vector<1x128xf32>
    %198 = math.exp %197 : vector<1x128xf32>
    %cst_41 = arith.constant 1.000000e+00 : f32
    %199 = vector.broadcast %cst_41 : f32 to vector<1x128xf32>
    %200 = arith.addf %199, %198 : vector<1x128xf32>
    %201 = arith.divf %199, %200 : vector<1x128xf32>
    %202 = vector.extract_strided_slice %191 {offsets = [0, 128], sizes = [1, 128], strides = [1, 1]} : vector<1x384xf32> to vector<1x128xf32>
    %203 = vector.extract_strided_slice %193 {offsets = [0, 128], sizes = [1, 128], strides = [1, 1]} : vector<1x384xf32> to vector<1x128xf32>
    %204 = arith.addf %202, %203 : vector<1x128xf32>
    %205 = arith.negf %204 : vector<1x128xf32>
    %206 = math.exp %205 : vector<1x128xf32>
    %cst_42 = arith.constant 1.000000e+00 : f32
    %207 = vector.broadcast %cst_42 : f32 to vector<1x128xf32>
    %208 = arith.addf %207, %206 : vector<1x128xf32>
    %209 = arith.divf %207, %208 : vector<1x128xf32>
    %210 = vector.extract_strided_slice %191 {offsets = [0, 256], sizes = [1, 128], strides = [1, 1]} : vector<1x384xf32> to vector<1x128xf32>
    %211 = vector.extract_strided_slice %193 {offsets = [0, 256], sizes = [1, 128], strides = [1, 1]} : vector<1x384xf32> to vector<1x128xf32>
    %212 = arith.mulf %201, %211 : vector<1x128xf32>
    %213 = arith.addf %210, %212 : vector<1x128xf32>
    %214 = math.tanh %213 : vector<1x128xf32>
    %cst_43 = arith.constant 1.000000e+00 : f32
    %215 = vector.broadcast %cst_43 : f32 to vector<1x128xf32>
    %216 = arith.subf %215, %209 : vector<1x128xf32>
    %217 = arith.mulf %216, %214 : vector<1x128xf32>
    %218 = arith.mulf %209, %189 : vector<1x128xf32>
    %219 = arith.addf %217, %218 : vector<1x128xf32>
    %c6 = arith.constant 6 : index
    %c0_44 = arith.constant 0 : index
    %220 = vector.load %arg9[%c6, %c0_44] : memref<8x128xf32, #tpu.memory_space<vmem>>, vector<1x128xf32>
    tpu.vector_store %arg9[%c6, %c0_44], %219 {strides = array<i32>} : memref<8x128xf32, #tpu.memory_space<vmem>>, vector<1x128xf32>,
    %221 = vector.extract_strided_slice %7 {offsets = [7, 0], sizes = [1, 384], strides = [1, 1]} : vector<8x384xf32> to vector<1x384xf32>
    %cst_45 = arith.constant dense<0.000000e+00> : vector<1x384xf32>
    %222 = tpu.matmul %219, %8, %cst_45 {dimension_numbers = #tpu.dot_dimension_numbers<[1], [0], [0], [1], [0, 0, 1, 1], [], []>} : vector<1x128xf32>, vector<128x384xf32>, vector<1x384xf32> -> vector<1x384xf32>
    %223 = arith.addf %222, %9 : vector<1x384xf32>
    %224 = vector.extract_strided_slice %221 {offsets = [0, 0], sizes = [1, 128], strides = [1, 1]} : vector<1x384xf32> to vector<1x128xf32>
    %225 = vector.extract_strided_slice %223 {offsets = [0, 0], sizes = [1, 128], strides = [1, 1]} : vector<1x384xf32> to vector<1x128xf32>
    %226 = arith.addf %224, %225 : vector<1x128xf32>
    %227 = arith.negf %226 : vector<1x128xf32>
    %228 = math.exp %227 : vector<1x128xf32>
    %cst_46 = arith.constant 1.000000e+00 : f32
    %229 = vector.broadcast %cst_46 : f32 to vector<1x128xf32>
    %230 = arith.addf %229, %228 : vector<1x128xf32>
    %231 = arith.divf %229, %230 : vector<1x128xf32>
    %232 = vector.extract_strided_slice %221 {offsets = [0, 128], sizes = [1, 128], strides = [1, 1]} : vector<1x384xf32> to vector<1x128xf32>
    %233 = vector.extract_strided_slice %223 {offsets = [0, 128], sizes = [1, 128], strides = [1, 1]} : vector<1x384xf32> to vector<1x128xf32>
    %234 = arith.addf %232, %233 : vector<1x128xf32>
    %235 = arith.negf %234 : vector<1x128xf32>
    %236 = math.exp %235 : vector<1x128xf32>
    %cst_47 = arith.constant 1.000000e+00 : f32
    %237 = vector.broadcast %cst_47 : f32 to vector<1x128xf32>
    %238 = arith.addf %237, %236 : vector<1x128xf32>
    %239 = arith.divf %237, %238 : vector<1x128xf32>
    %240 = vector.extract_strided_slice %221 {offsets = [0, 256], sizes = [1, 128], strides = [1, 1]} : vector<1x384xf32> to vector<1x128xf32>
    %241 = vector.extract_strided_slice %223 {offsets = [0, 256], sizes = [1, 128], strides = [1, 1]} : vector<1x384xf32> to vector<1x128xf32>
    %242 = arith.mulf %231, %241 : vector<1x128xf32>
    %243 = arith.addf %240, %242 : vector<1x128xf32>
    %244 = math.tanh %243 : vector<1x128xf32>
    %cst_48 = arith.constant 1.000000e+00 : f32
    %245 = vector.broadcast %cst_48 : f32 to vector<1x128xf32>
    %246 = arith.subf %245, %239 : vector<1x128xf32>
    %247 = arith.mulf %246, %244 : vector<1x128xf32>
    %248 = arith.mulf %239, %219 : vector<1x128xf32>
    %249 = arith.addf %247, %248 : vector<1x128xf32>
    %c7 = arith.constant 7 : index
    %c0_49 = arith.constant 0 : index
    %250 = vector.load %arg9[%c7, %c0_49] : memref<8x128xf32, #tpu.memory_space<vmem>>, vector<1x128xf32>
    tpu.vector_store %arg9[%c7, %c0_49], %249 {strides = array<i32>} : memref<8x128xf32, #tpu.memory_space<vmem>>, vector<1x128xf32>,
    %c0_50 = arith.constant 0 : index
    %c0_51 = arith.constant 0 : index
    %251 = vector.load %arg8[%c0_50, %c0_51] : memref<1x128xf32, #tpu.memory_space<vmem>>, vector<1x128xf32>
    tpu.vector_store %arg8[%c0_50, %c0_51], %249 {strides = array<i32>} : memref<1x128xf32, #tpu.memory_space<vmem>>, vector<1x128xf32>,
    %c0_52 = arith.constant 0 : index
    %c0_53 = arith.constant 0 : index
    %252 = vector.load %arg9[%c0_52, %c0_53] : memref<8x128xf32, #tpu.memory_space<vmem>>, vector<8x128xf32>
    %c0_54 = arith.constant 0 : index
    %c0_55 = arith.constant 0 : index
    %253 = vector.load %arg4[%c0_54, %c0_55] : memref<128x128xf32, #tpu.memory_space<vmem>>, vector<128x128xf32>
    %cst_56 = arith.constant dense<0.000000e+00> : vector<8x128xf32>
    %254 = tpu.matmul %252, %253, %cst_56 {dimension_numbers = #tpu.dot_dimension_numbers<[1], [0], [0], [1], [0, 0, 1, 1], [], []>} : vector<8x128xf32>, vector<128x128xf32>, vector<8x128xf32> -> vector<8x128xf32>
    %c0_57 = arith.constant 0 : index
    %c0_58 = arith.constant 0 : index
    %255 = vector.load %arg5[%c0_57, %c0_58] : memref<1x128xf32, #tpu.memory_space<vmem>>, vector<1x128xf32>
    %256 = vector.broadcast %255 : vector<1x128xf32> to vector<8x128xf32>
    %257 = arith.addf %254, %256 : vector<8x128xf32>
    %c0_59 = arith.constant 0 : index
    %c0_60 = arith.constant 0 : index
    %258 = vector.load %arg7[%c0_59, %c0_60] : memref<8x128xf32, #tpu.memory_space<vmem>>, vector<8x128xf32>
    tpu.vector_store %arg7[%c0_59, %c0_60], %257 {strides = array<i32>} : memref<8x128xf32, #tpu.memory_space<vmem>>, vector<8x128xf32>,
    return
  }
}

</mosaic_0001>

<bundles_post_ra>
// kernel: tpu_custom_call.1
= control target key start
LH: loop header
LB: loop body
LE: loop exit
PB: predicated region body
PF: predicated region fallthrough
CT: control target
= control target key end

     0   :  { %14 = vsyncpa [#allocation4], 0  ;;  %s3604_s0 = inlined_call_operand.vmem [shape: s32[8,1], index: 0, kind: input, shape index: {}]   ;;  %s3605_s1 = inlined_call_operand.hbm [shape: f32[128,384], index: 1, kind: input, shape index: {}]   ;;  %s3606_s2 = inlined_call_operand.hbm [shape: f32[128,384], index: 2, kind: input, shape index: {}]   ;;  %s3607_s3 = inlined_call_operand.vmem [shape: f32[1,384], index: 3, kind: input, shape index: {}]   ;;  %s3608_s4 = inlined_call_operand.hbm [shape: f32[128,128], index: 4, kind: input, shape index: {}]   ;;  %s3609_s5 = inlined_call_operand.vmem [shape: f32[1,128], index: 5, kind: input, shape index: {}]   ;;  %s3610_s6 = inlined_call_operand.vmem [shape: f32[1,128], index: 6, kind: input, shape index: {}]   ;;  %s3611_s7 = inlined_call_operand.hbm [shape: f32[8,128], index: 7, kind: output, shape index: {0}]   ;;  %s3612_s8 = inlined_call_operand.hbm [shape: f32[1,128], index: 8, kind: output, shape index: {1}]  }
   0x1   :  { %15 = vsyncpa [#allocation7], 0 }
   0x2   :  { %16 = vsyncpa [#allocation5], 0 }
   0x3   :  { %17 = vsyncpa [#allocation11], 0  ;;  %s2651_s27 = smov [#allocation6]   ;;  %s2652_s29 = smov [#allocation3]  }
   0x4   :  { %s37_s28 = sshll.u32 %s2651_s27, 4  ;;  %s25_s30 = sshll.u32 %s2652_s29, 4  ;;  %s38_s28 = int_to_ptr.vmem [resolvable:$true] %s37_s28  ;;  %s26_s30 = int_to_ptr.vmem [resolvable:$true] %s25_s30 }
   0x5   :  { %s2551_s9 = scalar_lea.vmem %s38_s28, 6144  ;;  %p2556_p1 = scmp.lt.s32.totalorder %s38_s28, %s38_s28 }
   0x6   :  { %p2552_p0 = scmp.ne.s32.totalorder %s38_s28, %s2551_s9  ;;  %p2557_p2 = scmp.lt.s32.totalorder %s2551_s9, %s2551_s9 }
   0x8   :  { %p2558_p3 = por %p2557_p2, %p2556_p1 }
   0xa   :  { %p2559_p4 = pnand %p2558_p3, %p2552_p0 }
   0xc   :  { %2562 = shalt.err (!%p2559_p4)
}
   0xd   :  { %s2653_s10 = smov 384   ;;  %s2654_s11 = smov 24  }
   0xe   :  { %43 = dma.hbm_to_vmem [thread:$0]  %s3606_s2, 6144, %s38_s28, [#allocation7], %s2653_s10, %s2653_s10, %s2654_s11  }
   0xf   :  { %s2571_s14 = scalar_lea.vmem %s26_s30, 6144  ;;  %p2576_p6 = scmp.lt.s32.totalorder %s26_s30, %s26_s30 }
  0x10   :  { %p2572_p5 = scmp.ne.s32.totalorder %s26_s30, %s2571_s14  ;;  %p2577_p7 = scmp.lt.s32.totalorder %s2571_s14, %s2571_s14 }
  0x12   :  { %p2578_p8 = por %p2577_p7, %p2576_p6 }
  0x14   :  { %p2579_p9 = pnand %p2578_p8, %p2572_p5 }
  0x16   :  { %2582 = shalt.err (!%p2579_p9)
}
  0x17   :  { %31 = dma.hbm_to_vmem [thread:$0]  %s3605_s1, 6144, %s26_s30, [#allocation4], %s2653_s10, %s2653_s10, %s2654_s11  }
  0x18   :  { %s2655_s17 = smov [#allocation8]  }
  0x19   :  { %s51_s18 = sshll.u32 %s2655_s17, 4  ;;  %s52_s18 = int_to_ptr.vmem [resolvable:$true] %s51_s18 }
  0x1a   :  { %s2591_s19 = scalar_lea.vmem %s52_s18, 2048  ;;  %p2596_p11 = scmp.lt.s32.totalorder %s52_s18, %s52_s18 }
  0x1b   :  { %p2592_p10 = scmp.ne.s32.totalorder %s52_s18, %s2591_s19  ;;  %p2597_p12 = scmp.lt.s32.totalorder %s2591_s19, %s2591_s19 }
  0x1d   :  { %p2598_p13 = por %p2597_p12, %p2596_p11 }
  0x1f   :  { %p2599_p0 = pnand %p2598_p13, %p2592_p10 }
  0x21   :  { %2602 = shalt.err (!%p2599_p0)
}
  0x22   :  { %s2656_s2 = smov 128   ;;  %s2657_s20 = smov 8  }
  0x23   :  { %57 = dma.hbm_to_vmem [thread:$0]  %s3608_s4, 2048, %s52_s18, [#allocation7], %s2656_s2, %s2656_s2, %s2657_s20  }
  0x24   :  { %2643 = dma.done.wait [#allocation4], 6144  }
  0x25   :  { %2644 = vsyncadd [#allocation4], 4294961152 }
  0x26   :  { %2645 = dma.done.wait [#allocation7], 8192  }
  0x27   :  { %2646 = vsyncadd [#allocation7], 4294959104  ;;  %v2658_v0 = vmov 0   ;;  %v3613_v1 = vmov 0.0   ;;  %vm2660_vm0 = vmmov 0   ;;  %v73_v2 = vld [vmem:[%s3604_s0] sm:$0xff]  ;;  %v71_v52 = vlaneseq }
  0x28   :  { %2414 = vset.pattern.permute.xlu0 %v2658_v0  ;;  %2051 = vmatprep.subr.mxu1 %v3613_v1  ;;  %v126_v3 = vld [vmem:[#allocation3 + $0x170] sm:$0xff]  ;;  %v125_v4 = vld [vmem:[#allocation3 + $0x168] sm:$0xff]  ;;  %v123_v5 = vld [vmem:[#allocation3 + $0x158] sm:$0xff]  ;;  %v2661_v58 = vmov 1.0  }
  0x29   :  { %192 = vmatprep.mubr.f32.mxu0 %v3613_v1  ;;  %2083 = vmatprep.mubr.msk.f32.mxu1 %vm2660_vm0, %v3613_v1  ;;  %v127_v6 = vld [vmem:[#allocation3 + $0x178] sm:$0xff]  ;;  %v122_v7 = vld [vmem:[#allocation3 + $0x150] sm:$0xff]  ;;  %v120_v8 = vld [vmem:[#allocation3 + $0x140] sm:$0xff]  ;;  %v72_v53 = vand.u32 127, %v71_v52 }
  0x2a   :  { %75 = vperm.xlu0 %2414, %v73_v2   ;;  %128 = vmatprep.subr.mxu0 %v126_v3  ;;  %v124_v9 = vld [vmem:[#allocation3 + $0x160] sm:$0xff]  ;;  %v119_v10 = vld [vmem:[#allocation3 + $0x138] sm:$0xff]  ;;  %v121_v11 = vld [vmem:[#allocation3 + $0x148] sm:$0xff] }
  0x2b   :  { %129 = vmatpush1.msra.mxu0 %v125_v4  ;;  %2052 = vmatpush3.msra.mxu1 %v127_v6  ;;  %v117_v12 = vld [vmem:[#allocation3 + $0x128] sm:$0xff]  ;;  %v116_v13 = vld [vmem:[#allocation3 + $0x120] sm:$0xff]  ;;  %v118_v14 = vld [vmem:[#allocation3 + $0x130] sm:$0xff] }
  0x2c   :  { %130 = vmatprep.subr.mxu0 %v123_v5  ;;  %2053 = vmatprep.subr.mxu1 %v3613_v1  ;;  %v114_v15 = vld [vmem:[#allocation3 + $0x110] sm:$0xff]  ;;  %v113_v16 = vld [vmem:[#allocation3 + $0x108] sm:$0xff]  ;;  %v115_v17 = vld [vmem:[#allocation3 + $0x118] sm:$0xff] }
  0x2d   :  { %131 = vmatpush1.msra.mxu0 %v122_v7  ;;  %2054 = vmatpush3.msra.mxu1 %v124_v9  ;;  %v111_v18 = vld [vmem:[#allocation3 + $0xf8] sm:$0xff]  ;;  %v110_v19 = vld [vmem:[#allocation3 + $0xf0] sm:$0xff]  ;;  %v112_v20 = vld [vmem:[#allocation3 + $0x100] sm:$0xff] }
  0x2e   :  { %132 = vmatprep.subr.mxu0 %v120_v8  ;;  %2055 = vmatprep.subr.mxu1 %v3613_v1  ;;  %v108_v21 = vld [vmem:[#allocation3 + $0xe0] sm:$0xff]  ;;  %v107_v22 = vld [vmem:[#allocation3 + $0xd8] sm:$0xff]  ;;  %v109_v23 = vld [vmem:[#allocation3 + $0xe8] sm:$0xff] }
  0x2f   :  { %133 = vmatpush1.msra.mxu0 %v119_v10  ;;  %2056 = vmatpush3.msra.mxu1 %v121_v11  ;;  %v105_v24 = vld [vmem:[#allocation3 + $0xc8] sm:$0xff]  ;;  %v104_v25 = vld [vmem:[#allocation3 + $0xc0] sm:$0xff]  ;;  %v106_v26 = vld [vmem:[#allocation3 + $0xd0] sm:$0xff] }
  0x30   :  { %134 = vmatprep.subr.mxu0 %v117_v12  ;;  %2057 = vmatprep.subr.mxu1 %v3613_v1  ;;  %v102_v27 = vld [vmem:[#allocation3 + $0xb0] sm:$0xff]  ;;  %v101_v28 = vld [vmem:[#allocation3 + $0xa8] sm:$0xff]  ;;  %v103_v29 = vld [vmem:[#allocation3 + $0xb8] sm:$0xff] }
  0x31   :  { %135 = vmatpush1.msra.mxu0 %v116_v13  ;;  %2058 = vmatpush3.msra.mxu1 %v118_v14  ;;  %v99_v30 = vld [vmem:[#allocation3 + $0x98] sm:$0xff]  ;;  %v98_v31 = vld [vmem:[#allocation3 + $0x90] sm:$0xff]  ;;  %v100_v32 = vld [vmem:[#allocation3 + $0xa0] sm:$0xff] }
  0x32   :  { %136 = vmatprep.subr.mxu0 %v114_v15  ;;  %2059 = vmatprep.subr.mxu1 %v3613_v1  ;;  %v96_v33 = vld [vmem:[#allocation3 + $0x80] sm:$0xff]  ;;  %v95_v34 = vld [vmem:[#allocation3 + $0x78] sm:$0xff]  ;;  %v97_v35 = vld [vmem:[#allocation3 + $0x88] sm:$0xff] }
  0x33   :  { %137 = vmatpush1.msra.mxu0 %v113_v16  ;;  %2060 = vmatpush3.msra.mxu1 %v115_v17  ;;  %v93_v36 = vld [vmem:[#allocation3 + $0x68] sm:$0xff]  ;;  %v92_v37 = vld [vmem:[#allocation3 + $0x60] sm:$0xff]  ;;  %v94_v38 = vld [vmem:[#allocation3 + $0x70] sm:$0xff] }
  0x34   :  { %138 = vmatprep.subr.mxu0 %v111_v18  ;;  %2061 = vmatprep.subr.mxu1 %v3613_v1  ;;  %v90_v39 = vld [vmem:[#allocation3 + $0x50] sm:$0xff]  ;;  %v89_v40 = vld [vmem:[#allocation3 + $0x48] sm:$0xff]  ;;  %v91_v41 = vld [vmem:[#allocation3 + $0x58] sm:$0xff] }
  0x35   :  { %139 = vmatpush1.msra.mxu0 %v110_v19  ;;  %2062 = vmatpush3.msra.mxu1 %v112_v20  ;;  %v87_v42 = vld [vmem:[#allocation3 + $0x38] sm:$0xff]  ;;  %v86_v43 = vld [vmem:[#allocation3 + $0x30] sm:$0xff]  ;;  %v88_v44 = vld [vmem:[#allocation3 + $0x40] sm:$0xff] }
  0x36   :  { %140 = vmatprep.subr.mxu0 %v108_v21  ;;  %2063 = vmatprep.subr.mxu1 %v3613_v1  ;;  %v84_v45 = vld [vmem:[#allocation3 + $0x20] sm:$0xff]  ;;  %v83_v46 = vld [vmem:[#allocation3 + $0x18] sm:$0xff]  ;;  %v85_v47 = vld [vmem:[#allocation3 + $0x28] sm:$0xff] }
  0x37   :  { %141 = vmatpush1.msra.mxu0 %v107_v22  ;;  %2064 = vmatpush3.msra.mxu1 %v109_v23  ;;  %v81_v48 = vld [vmem:[#allocation3 + $0x8] sm:$0xff]  ;;  %v80_v49 = vld [vmem:[#allocation3] sm:$0xff]  ;;  %v82_v50 = vld [vmem:[#allocation3 + $0x10] sm:$0xff] }
  0x38   :  { %142 = vmatprep.subr.mxu0 %v105_v24  ;;  %2065 = vmatprep.subr.mxu1 %v3613_v1  ;;  %v2739_v51 = vld [vmem:[#allocation6 + $0x170] sm:$0xff]  ;;  %v2745_v55 = vld [vmem:[#allocation6 + $0x168] sm:$0xff]  ;;  %v2747_v56 = vld [vmem:[#allocation6 + $0x158] sm:$0xff] }
  0x39   :  { %143 = vmatpush1.msra.mxu0 %v104_v25  ;;  %2066 = vmatpush3.msra.mxu1 %v106_v26  ;;  %3641 = vst [vmem:[#allocation16_spill] sm:$0xff] %v2739_v51  ;;  %v2749_v57 = vld [vmem:[#allocation6 + $0x178] sm:$0xff]  ;;  %v2751_v59 = vld [vmem:[#allocation6 + $0x150] sm:$0xff]  ;;  %v2754_v60 = vld [vmem:[#allocation6 + $0x140] sm:$0xff] }
  0x3a   :  { %144 = vmatprep.subr.mxu0 %v102_v27  ;;  %2067 = vmatprep.subr.mxu1 %v3613_v1  ;;  %v2757_v61 = vld [vmem:[#allocation6 + $0x160] sm:$0xff]  ;;  %v2760_v62 = vld [vmem:[#allocation6 + $0x138] sm:$0xff]  ;;  %v2764_v63 = vld [vmem:[#allocation6 + $0x128] sm:$0xff] }
  0x3b   :  { %145 = vmatpush1.msra.mxu0 %v101_v28  ;;  %2068 = vmatpush3.msra.mxu1 %v103_v29  ;;  %v2767_v0 = vld [vmem:[#allocation6 + $0x148] sm:$0xff]  ;;  %v2770_v2 = vld [vmem:[#allocation6 + $0x120] sm:$0xff]  ;;  %v2774_v3 = vld [vmem:[#allocation6 + $0x110] sm:$0xff] }
  0x3c   :  { %146 = vmatprep.subr.mxu0 %v99_v30  ;;  %2069 = vmatprep.subr.mxu1 %v3613_v1  ;;  %v2777_v4 = vld [vmem:[#allocation6 + $0x130] sm:$0xff]  ;;  %v2780_v5 = vld [vmem:[#allocation6 + $0x108] sm:$0xff]  ;;  %v2784_v6 = vld [vmem:[#allocation6 + $0xf8] sm:$0xff] }
  0x3d   :  { %147 = vmatpush1.msra.mxu0 %v98_v31  ;;  %2070 = vmatpush3.msra.mxu1 %v100_v32  ;;  %v2787_v7 = vld [vmem:[#allocation6 + $0x118] sm:$0xff]  ;;  %v2790_v8 = vld [vmem:[#allocation6 + $0xf0] sm:$0xff]  ;;  %v2794_v9 = vld [vmem:[#allocation6 + $0xe0] sm:$0xff] }
  0x3e   :  { %148 = vmatprep.subr.mxu0 %v96_v33  ;;  %2071 = vmatprep.subr.mxu1 %v3613_v1  ;;  %v2797_v10 = vld [vmem:[#allocation6 + $0x100] sm:$0xff]  ;;  %v2800_v11 = vld [vmem:[#allocation6 + $0xd8] sm:$0xff]  ;;  %v2804_v12 = vld [vmem:[#allocation6 + $0xc8] sm:$0xff] }
  0x3f   :  { %149 = vmatpush1.msra.mxu0 %v95_v34  ;;  %2072 = vmatpush3.msra.mxu1 %v97_v35  ;;  %v2807_v13 = vld [vmem:[#allocation6 + $0xe8] sm:$0xff]  ;;  %v2810_v14 = vld [vmem:[#allocation6 + $0xc0] sm:$0xff]  ;;  %v2814_v15 = vld [vmem:[#allocation6 + $0xb0] sm:$0xff] }
  0x40   :  { %150 = vmatprep.subr.mxu0 %v93_v36  ;;  %2073 = vmatprep.subr.mxu1 %v3613_v1  ;;  %v2817_v16 = vld [vmem:[#allocation6 + $0xd0] sm:$0xff]  ;;  %v2820_v17 = vld [vmem:[#allocation6 + $0xa8] sm:$0xff]  ;;  %v2824_v18 = vld [vmem:[#allocation6 + $0x98] sm:$0xff] }
  0x41   :  { %151 = vmatpush1.msra.mxu0 %v92_v37  ;;  %2074 = vmatpush3.msra.mxu1 %v94_v38  ;;  %v2827_v19 = vld [vmem:[#allocation6 + $0xb8] sm:$0xff]  ;;  %v2830_v20 = vld [vmem:[#allocation6 + $0x90] sm:$0xff]  ;;  %v2834_v21 = vld [vmem:[#allocation6 + $0x80] sm:$0xff] }
  0x42   :  { %152 = vmatprep.subr.mxu0 %v90_v39  ;;  %2075 = vmatprep.subr.mxu1 %v3613_v1  ;;  %v2837_v22 = vld [vmem:[#allocation6 + $0xa0] sm:$0xff]  ;;  %v2840_v23 = vld [vmem:[#allocation6 + $0x78] sm:$0xff]  ;;  %v2844_v24 = vld [vmem:[#allocation6 + $0x68] sm:$0xff] }
  0x43   :  { %153 = vmatpush1.msra.mxu0 %v89_v40  ;;  %2076 = vmatpush3.msra.mxu1 %v91_v41  ;;  %v2847_v25 = vld [vmem:[#allocation6 + $0x88] sm:$0xff]  ;;  %v2850_v26 = vld [vmem:[#allocation6 + $0x60] sm:$0xff]  ;;  %v2854_v27 = vld [vmem:[#allocation6 + $0x50] sm:$0xff] }
  0x44   :  { %154 = vmatprep.subr.mxu0 %v87_v42  ;;  %2077 = vmatprep.subr.mxu1 %v3613_v1  ;;  %v2857_v28 = vld [vmem:[#allocation6 + $0x70] sm:$0xff]  ;;  %v2860_v29 = vld [vmem:[#allocation6 + $0x48] sm:$0xff]  ;;  %v2864_v30 = vld [vmem:[#allocation6 + $0x38] sm:$0xff] }
  0x45   :  { %155 = vmatpush1.msra.mxu0 %v86_v43  ;;  %2078 = vmatpush3.msra.mxu1 %v88_v44  ;;  %v2867_v31 = vld [vmem:[#allocation6 + $0x58] sm:$0xff]  ;;  %v2870_v32 = vld [vmem:[#allocation6 + $0x30] sm:$0xff]  ;;  %v2874_v33 = vld [vmem:[#allocation6 + $0x20] sm:$0xff]  ;;  %v321_v43 = vshrl.u32 %v71_v52, 7 }
  0x46   :  { %156 = vmatprep.subr.mxu0 %v84_v45  ;;  %2079 = vmatprep.subr.mxu1 %v3613_v1  ;;  %3642 = vst [vmem:[#allocation17_spill] sm:$0xff] %v2874_v33  ;;  %v2877_v34 = vld [vmem:[#allocation6 + $0x40] sm:$0xff]  ;;  %v2880_v35 = vld [vmem:[#allocation6 + $0x18] sm:$0xff]  ;;  %v2884_v36 = vld [vmem:[#allocation6 + $0x8] sm:$0xff] }
  0x47   :  { %157 = vmatpush1.msra.mxu0 %v83_v46  ;;  %2080 = vmatpush3.msra.mxu1 %v85_v47  ;;  %3643 = vst [vmem:[#allocation18_spill] sm:$0xff] %v2877_v34  ;;  %3644 = vst [vmem:[#allocation19_spill] sm:$0xff] %v2880_v35  ;;  %v2887_v37 = vld [vmem:[#allocation6 + $0x28] sm:$0xff]  ;;  %v2890_v38 = vld [vmem:[#allocation6] sm:$0xff]  ;;  %v322_v44 = vsub.s32 0, %v321_v43 }
  0x48   :  { %158 = vmatprep.subr.mxu0 %v81_v48  ;;  %2081 = vmatprep.subr.mxu1 %v3613_v1  ;;  %3645 = vst [vmem:[#allocation20_spill] sm:$0xff] %v2884_v36  ;;  %3646 = vst [vmem:[#allocation21_spill] sm:$0xff] %v2887_v37  ;;  %v2897_v39 = vld [vmem:[%s3610_s6] sm:$0x1]  ;;  %v2900_v40 = vld [vmem:[#allocation6 + $0x10] sm:$0xff]  ;;  %v326_v48 = vsub.s32 1, %v321_v43 }
  0x49   :  { %159 = vmatpush1.msra.mxu0 %v80_v49  ;;  %2082 = vmatpush3.msra.mxu1 %v82_v50  ;;  %3647 = vst [vmem:[#allocation22_spill] sm:$0xff] %v2890_v38  ;;  %3648 = vst [vmem:[#allocation23_spill] sm:$0xff] %v2900_v40  ;;  %v317_v45 = vld [vmem:[%s3607_s3] sm:$0x7]  ;;  %s2662_s3 = smov [#allocation10]  }
  0x4a   :  { %335 = vmatprep.subr.mxu0 %v2739_v51  ;;  %2086 = vmatprep.subr.mxu1 %v3613_v1  ;;  %v2988_v47 = vrot.slane %v317_v45, %v322_v44  ;;  %s1847_s25 = sshll.u32 %s2662_s3, 4  ;;  %s1848_s25 = int_to_ptr.vmem [resolvable:$true] %s1847_s25 }
  0x4b   :  { %s2603_s26 = scalar_lea.vmem %s1848_s25, 16  ;;  %s2607_s27 = scalar_lea.vmem %s1848_s25, 32 }
  0x4c   :  { %3649 = vst [vmem:[#allocation24_spill] sm:$0xff] %v2988_v47  ;;  %p2604_p1 = scmp.ne.s32.totalorder %s1848_s25, %s2603_s26  ;;  %p2608_p2 = scmp.lt.s32.totalorder %s1848_s25, %s1848_s25 }
  0x4d   :  { %p2609_p3 = scmp.lt.s32.totalorder %s2607_s27, %s2603_s26 }
  0x4f   :  { %p2610_p4 = por %p2609_p3, %p2608_p2 }
  0x51   :  { %p2611_p5 = pnand %p2610_p4, %p2604_p1 }
  0xa5   :  { %v76_v54 = vpop.permute.xlu0 %75 }
  0xa6   :  { %vm77_vm1 = vcmp.eq.s32.totalorder %v72_v53, %v76_v54  ;;  %v2992_v53 = vrot.slane %v317_v45, %v326_v48  ;;  %v330_v48 = vsub.s32 2, %v321_v43  ;;  %v3652_v43 = vld [vmem:[#allocation19_spill] sm:$0xff] }
  0xa7   :  { %1862 = vmatmul.mubr.msk.f32.vlgmr.msra.gmra.mxu0 %vm77_vm1, %v2661_v58  ;;  %2084 = vmatmul.mubr.msk.f32.vlgmr.msra.gmra.mxu1 %vm77_vm1, %v2661_v58 }
  0xa8   :  { %336 = vmatpush1.msra.mxu0 %v2745_v55  ;;  %399 = vmatprep.mubr.f32.mxu0 %v3613_v1 }
  0xa9   :  { %337 = vmatprep.subr.mxu0 %v2747_v56  ;;  %2087 = vmatpush3.msra.mxu1 %v2749_v57 }
  0xaa   :  { %338 = vmatpush1.msra.mxu0 %v2751_v59  ;;  %2088 = vmatprep.subr.mxu1 %v3613_v1 }
  0xab   :  { %339 = vmatprep.subr.mxu0 %v2754_v60  ;;  %2089 = vmatpush3.msra.mxu1 %v2757_v61 }
  0xac   :  { %340 = vmatpush1.msra.mxu0 %v2760_v62  ;;  %2090 = vmatprep.subr.mxu1 %v3613_v1 }
  0xad   :  { %341 = vmatprep.subr.mxu0 %v2764_v63  ;;  %2091 = vmatpush3.msra.mxu1 %v2767_v0 }
  0xae   :  { %342 = vmatpush1.msra.mxu0 %v2770_v2  ;;  %2092 = vmatprep.subr.mxu1 %v3613_v1 }
  0xaf   :  { %343 = vmatprep.subr.mxu0 %v2774_v3  ;;  %2093 = vmatpush3.msra.mxu1 %v2777_v4 }
  0xb0   :  { %344 = vmatpush1.msra.mxu0 %v2780_v5  ;;  %2094 = vmatprep.subr.mxu1 %v3613_v1 }
  0xb1   :  { %345 = vmatprep.subr.mxu0 %v2784_v6  ;;  %2095 = vmatpush3.msra.mxu1 %v2787_v7 }
  0xb2   :  { %346 = vmatpush1.msra.mxu0 %v2790_v8  ;;  %2096 = vmatprep.subr.mxu1 %v3613_v1 }
  0xb3   :  { %347 = vmatprep.subr.mxu0 %v2794_v9  ;;  %2097 = vmatpush3.msra.mxu1 %v2797_v10 }
  0xb4   :  { %348 = vmatpush1.msra.mxu0 %v2800_v11  ;;  %2098 = vmatprep.subr.mxu1 %v3613_v1 }
  0xb5   :  { %349 = vmatprep.subr.mxu0 %v2804_v12  ;;  %2099 = vmatpush3.msra.mxu1 %v2807_v13 }
  0xb6   :  { %350 = vmatpush1.msra.mxu0 %v2810_v14  ;;  %2100 = vmatprep.subr.mxu1 %v3613_v1 }
  0xb7   :  { %351 = vmatprep.subr.mxu0 %v2814_v15  ;;  %2101 = vmatpush3.msra.mxu1 %v2817_v16 }
  0xb8   :  { %352 = vmatpush1.msra.mxu0 %v2820_v17  ;;  %2102 = vmatprep.subr.mxu1 %v3613_v1 }
  0xb9   :  { %353 = vmatprep.subr.mxu0 %v2824_v18  ;;  %2103 = vmatpush3.msra.mxu1 %v2827_v19 }
  0xba   :  { %354 = vmatpush1.msra.mxu0 %v2830_v20  ;;  %2104 = vmatprep.subr.mxu1 %v3613_v1 }
  0xbb   :  { %355 = vmatprep.subr.mxu0 %v2834_v21  ;;  %2105 = vmatpush3.msra.mxu1 %v2837_v22 }
  0xbc   :  { %356 = vmatpush1.msra.mxu0 %v2840_v23  ;;  %2106 = vmatprep.subr.mxu1 %v3613_v1 }
  0xbd   :  { %357 = vmatprep.subr.mxu0 %v2844_v24  ;;  %2107 = vmatpush3.msra.mxu1 %v2847_v25 }
  0xbe   :  { %358 = vmatpush1.msra.mxu0 %v2850_v26  ;;  %2108 = vmatprep.subr.mxu1 %v3613_v1 }
  0xbf   :  { %359 = vmatprep.subr.mxu0 %v2854_v27  ;;  %2109 = vmatpush3.msra.mxu1 %v2857_v28 }
  0xc0   :  { %360 = vmatpush1.msra.mxu0 %v2860_v29  ;;  %2110 = vmatprep.subr.mxu1 %v3613_v1 }
  0xc1   :  { %361 = vmatprep.subr.mxu0 %v2864_v30  ;;  %2111 = vmatpush3.msra.mxu1 %v2867_v31 }
  0xc2   :  { %362 = vmatpush1.msra.mxu0 %v2870_v32  ;;  %2112 = vmatprep.subr.mxu1 %v3613_v1 }
  0xc3   :  { %363 = vmatprep.subr.mxu0 %v2874_v33  ;;  %2113 = vmatpush3.msra.mxu1 %v2877_v34 }
  0xc4   :  { %364 = vmatpush1.msra.mxu0 %v2880_v35  ;;  %2114 = vmatprep.subr.mxu1 %v3613_v1 }
  0xc5   :  { %365 = vmatprep.subr.mxu0 %v2884_v36  ;;  %2115 = vmatpush3.msra.mxu1 %v2887_v37 }
  0xc6   :  { %366 = vmatpush1.msra.mxu0 %v2890_v38  ;;  %2116 = vmatprep.subr.mxu1 %v3613_v1 }
  0xc7   :  { %400 = vmatmul.mubr.f32.vlgmr.msra.gmra.mxu0 %v2897_v39  ;;  %2117 = vmatpush3.msra.mxu1 %v2900_v40 }
  0xc8   :  { %2118 = vmatprep.mubr.msk.f32.mxu1 %vm2660_vm0, %v3613_v1  ;;  %498 = vmatprep.subr.mxu0 %v2739_v51 }
  0xc9   :  { %2119 = vmatmul.mubr.f32.vlgmr.msra.gmra.mxu1 %v2897_v39  ;;  %2121 = vmatprep.subr.mxu1 %v3613_v1 }
  0xca   :  { %499 = vmatpush1.msra.mxu0 %v2745_v55  ;;  %2122 = vmatpush3.msra.mxu1 %v2749_v57 }
  0xcb   :  { %500 = vmatprep.subr.mxu0 %v2747_v56  ;;  %2123 = vmatprep.subr.mxu1 %v3613_v1 }
  0xcc   :  { %501 = vmatpush1.msra.mxu0 %v2751_v59  ;;  %2124 = vmatpush3.msra.mxu1 %v2757_v61 }
  0xcd   :  { %502 = vmatprep.subr.mxu0 %v2754_v60  ;;  %2125 = vmatprep.subr.mxu1 %v3613_v1 }
  0xce   :  { %503 = vmatpush1.msra.mxu0 %v2760_v62  ;;  %2126 = vmatpush3.msra.mxu1 %v2767_v0 }
  0xcf   :  { %504 = vmatprep.subr.mxu0 %v2764_v63  ;;  %2127 = vmatprep.subr.mxu1 %v3613_v1 }
  0xd0   :  { %505 = vmatpush1.msra.mxu0 %v2770_v2  ;;  %2128 = vmatpush3.msra.mxu1 %v2777_v4 }
  0xd1   :  { %506 = vmatprep.subr.mxu0 %v2774_v3  ;;  %2129 = vmatprep.subr.mxu1 %v3613_v1 }
  0xd2   :  { %507 = vmatpush1.msra.mxu0 %v2780_v5  ;;  %2130 = vmatpush3.msra.mxu1 %v2787_v7 }
  0xd3   :  { %508 = vmatprep.subr.mxu0 %v2784_v6  ;;  %2131 = vmatprep.subr.mxu1 %v3613_v1 }
  0xd4   :  { %509 = vmatpush1.msra.mxu0 %v2790_v8  ;;  %2132 = vmatpush3.msra.mxu1 %v2797_v10 }
  0xd5   :  { %510 = vmatprep.subr.mxu0 %v2794_v9  ;;  %2133 = vmatprep.subr.mxu1 %v3613_v1 }
  0xd6   :  { %511 = vmatpush1.msra.mxu0 %v2800_v11  ;;  %2134 = vmatpush3.msra.mxu1 %v2807_v13 }
  0xd7   :  { %512 = vmatprep.subr.mxu0 %v2804_v12  ;;  %2135 = vmatprep.subr.mxu1 %v3613_v1 }
  0xd8   :  { %513 = vmatpush1.msra.mxu0 %v2810_v14  ;;  %2136 = vmatpush3.msra.mxu1 %v2817_v16 }
  0xd9   :  { %514 = vmatprep.subr.mxu0 %v2814_v15  ;;  %2137 = vmatprep.subr.mxu1 %v3613_v1 }
  0xda   :  { %515 = vmatpush1.msra.mxu0 %v2820_v17  ;;  %2138 = vmatpush3.msra.mxu1 %v2827_v19 }
  0xdb   :  { %516 = vmatprep.subr.mxu0 %v2824_v18  ;;  %2139 = vmatprep.subr.mxu1 %v3613_v1 }
  0xdc   :  { %517 = vmatpush1.msra.mxu0 %v2830_v20  ;;  %2140 = vmatpush3.msra.mxu1 %v2837_v22 }
  0xdd   :  { %518 = vmatprep.subr.mxu0 %v2834_v21  ;;  %2141 = vmatprep.subr.mxu1 %v3613_v1 }
  0xde   :  { %519 = vmatpush1.msra.mxu0 %v2840_v23  ;;  %2142 = vmatpush3.msra.mxu1 %v2847_v25 }
  0xdf   :  { %520 = vmatprep.subr.mxu0 %v2844_v24  ;;  %2143 = vmatprep.subr.mxu1 %v3613_v1 }
  0xe0   :  { %521 = vmatpush1.msra.mxu0 %v2850_v26  ;;  %2144 = vmatpush3.msra.mxu1 %v2857_v28 }
  0xe1   :  { %522 = vmatprep.subr.mxu0 %v2854_v27  ;;  %2145 = vmatprep.subr.mxu1 %v3613_v1 }
  0xe2   :  { %523 = vmatpush1.msra.mxu0 %v2860_v29  ;;  %2146 = vmatpush3.msra.mxu1 %v2867_v31 }
  0xe3   :  { %524 = vmatprep.subr.mxu0 %v2864_v30  ;;  %2147 = vmatprep.subr.mxu1 %v3613_v1 }
  0xe4   :  { %525 = vmatpush1.msra.mxu0 %v2870_v32  ;;  %2148 = vmatpush3.msra.mxu1 %v2877_v34 }
  0xe5   :  { %526 = vmatprep.subr.mxu0 %v2874_v33  ;;  %2149 = vmatprep.subr.mxu1 %v3613_v1 }
  0xe6   :  { %527 = vmatpush1.msra.mxu0 %v2880_v35  ;;  %2150 = vmatpush3.msra.mxu1 %v2887_v37  ;;  %v2998_v35 = vrot.slane %v317_v45, %v330_v48  ;;  %v3653_v45 = vld [vmem:[#allocation21_spill] sm:$0xff]  ;;  %v3657_v48 = vld [vmem:[#allocation16_spill] sm:$0xff] }
  0xe7   :  { %528 = vmatprep.subr.mxu0 %v2884_v36  ;;  %2151 = vmatprep.subr.mxu1 %v3613_v1 }
  0xe8   :  { %529 = vmatpush1.msra.mxu0 %v2890_v38  ;;  %562 = vmatprep.mubr.f32.mxu0 %v3613_v1 }
  0xe9   :  { %2152 = vmatpush3.msra.mxu1 %v2900_v40  ;;  %2153 = vmatprep.mubr.msk.f32.mxu1 %vm2660_vm0, %v3613_v1 }
  0xea   :  { %676 = vmatprep.subr.mxu0 %v2739_v51  ;;  %2156 = vmatprep.subr.mxu1 %v3613_v1 }
 0x167   :  { %v2980_v41 = vpop.f32.mrf.mxu1  ;;  %v2986_v46 = vpop.f32.mrf.mxu0 }
 0x169   :  { %v2085_v42 = vpop.f32.mrf.mxu1  ;;  %v2990_v49 = vpop.f32.mrf.mxu0 }
 0x187   :  { %v401_v50 = vpop.f32.mrf.mxu0 }
 0x188   :  { %v402_v54 = vadd.f32 %v401_v50, %v2988_v47 }
 0x189   :  { %v403_v58 = vpop.f32.mrf.mxu0  ;;  %v472_v42 = vpop.f32.mrf.mxu1 }
 0x18a   :  { %v476_v52 = vadd.f32 %v402_v54, %v2986_v46  ;;  %v404_v40 = vadd.f32 %v403_v58, %v2992_v53  ;;  %v473_v33 = vadd.f32 %v472_v42, %v2998_v35  ;;  %v3655_v42 = vld [vmem:[#allocation22_spill] sm:$0xff] }
 0x18b   :  { %v2120_v1 = vpop.f32.mrf.mxu1 }
 0x18c   :  { %v1864_v51 = vmul.f32 -1.442695, %v476_v52  ;;  %v483_v44 = vadd.f32 %v404_v40, %v2990_v49 }
 0x18e   :  { %2415 = vpow2.f32 %v1864_v51  ;;  %v1865_v38 = vmul.f32 -1.442695, %v483_v44  ;;  %v3656_v44 = vld [vmem:[#allocation23_spill] sm:$0xff] }
 0x190   :  { %2417 = vpow2.f32 %v1865_v38 }
 0x19b   :  { %v2416_v36 = vpop.eup %2415 }
 0x19c   :  { %v480_v37 = vadd.f32 1.0, %v2416_v36 }
 0x19d   :  { %v2418_v50 = vpop.eup %2417 }
 0x19e   :  { %2419 = vrcp.f32 %v480_v37  ;;  %v487_v47 = vadd.f32 1.0, %v2418_v50 }
 0x1a0   :  { %2421 = vrcp.f32 %v487_v47  ;;  %v3654_v47 = vld [vmem:[#allocation20_spill] sm:$0xff] }
 0x1ab   :  { %v2420_v54 = vpop.eup %2419 }
 0x1ac   :  { %v490_v1 = vmul.f32 %v2420_v54, %v473_v33  ;;  %v3650_v33 = vmov 0.0  }
 0x1ad   :  { %v2422_v51 = vpop.eup %2421 }
 0x1ae   :  { %v491_v58 = vadd.f32 %v490_v1, %v2980_v41  ;;  %v493_v40 = vsub.f32 1.0, %v2422_v51  ;;  %v495_v36 = vmul.f32 %v2422_v51, %v2897_v39  ;;  %v3651_v39 = vld [vmem:[#allocation17_spill] sm:$0xff]  ;;  %v3658_v1 = vld [vmem:[#allocation24_spill] sm:$0xff] }
 0x1b0   :  { %2423 = vtanh.f32 %v491_v58 }
 0x1bd   :  { %v2424_v52 = vpop.eup %2423 }
 0x1be   :  { %v494_v38 = vmul.f32 %v2424_v52, %v493_v40 }
 0x1c0   :  { %v3003_v37 = vadd.f32 %v495_v36, %v494_v38 }
 0x1c2   :  { %497 = vst [vmem:[#allocation2] sm:$0x1] %v3003_v37  ;;  %563 = vmatmul.mubr.f32.vlgmr.msra.gmra.mxu0 %v3003_v37  ;;  %2154 = vmatmul.mubr.f32.vlgmr.msra.gmra.mxu1 %v3003_v37 }
 0x1c3   :  { %677 = vmatpush1.msra.mxu0 %v2745_v55  ;;  %2157 = vmatpush3.msra.mxu1 %v2749_v57 }
 0x1c4   :  { %678 = vmatprep.subr.mxu0 %v2747_v56  ;;  %2158 = vmatprep.subr.mxu1 %v3650_v33 }
 0x1c5   :  { %679 = vmatpush1.msra.mxu0 %v2751_v59  ;;  %2159 = vmatpush3.msra.mxu1 %v2757_v61 }
 0x1c6   :  { %680 = vmatprep.subr.mxu0 %v2754_v60  ;;  %2160 = vmatprep.subr.mxu1 %v3650_v33 }
 0x1c7   :  { %681 = vmatpush1.msra.mxu0 %v2760_v62  ;;  %2161 = vmatpush3.msra.mxu1 %v2767_v0 }
 0x1c8   :  { %682 = vmatprep.subr.mxu0 %v2764_v63  ;;  %2162 = vmatprep.subr.mxu1 %v3650_v33 }
 0x1c9   :  { %683 = vmatpush1.msra.mxu0 %v2770_v2  ;;  %2163 = vmatpush3.msra.mxu1 %v2777_v4 }
 0x1ca   :  { %684 = vmatprep.subr.mxu0 %v2774_v3  ;;  %2164 = vmatprep.subr.mxu1 %v3650_v33 }
 0x1cb   :  { %685 = vmatpush1.msra.mxu0 %v2780_v5  ;;  %2165 = vmatpush3.msra.mxu1 %v2787_v7 }
 0x1cc   :  { %686 = vmatprep.subr.mxu0 %v2784_v6  ;;  %2166 = vmatprep.subr.mxu1 %v3650_v33 }
 0x1cd   :  { %687 = vmatpush1.msra.mxu0 %v2790_v8  ;;  %2167 = vmatpush3.msra.mxu1 %v2797_v10 }
 0x1ce   :  { %688 = vmatprep.subr.mxu0 %v2794_v9  ;;  %2168 = vmatprep.subr.mxu1 %v3650_v33 }
 0x1cf   :  { %689 = vmatpush1.msra.mxu0 %v2800_v11  ;;  %2169 = vmatpush3.msra.mxu1 %v2807_v13 }
 0x1d0   :  { %690 = vmatprep.subr.mxu0 %v2804_v12  ;;  %2170 = vmatprep.subr.mxu1 %v3650_v33 }
 0x1d1   :  { %691 = vmatpush1.msra.mxu0 %v2810_v14  ;;  %2171 = vmatpush3.msra.mxu1 %v2817_v16 }
 0x1d2   :  { %692 = vmatprep.subr.mxu0 %v2814_v15  ;;  %2172 = vmatprep.subr.mxu1 %v3650_v33 }
 0x1d3   :  { %693 = vmatpush1.msra.mxu0 %v2820_v17  ;;  %2173 = vmatpush3.msra.mxu1 %v2827_v19 }
 0x1d4   :  { %694 = vmatprep.subr.mxu0 %v2824_v18  ;;  %2174 = vmatprep.subr.mxu1 %v3650_v33 }
 0x1d5   :  { %695 = vmatpush1.msra.mxu0 %v2830_v20  ;;  %2175 = vmatpush3.msra.mxu1 %v2837_v22 }
 0x1d6   :  { %696 = vmatprep.subr.mxu0 %v2834_v21  ;;  %2176 = vmatprep.subr.mxu1 %v3650_v33 }
 0x1d7   :  { %697 = vmatpush1.msra.mxu0 %v2840_v23  ;;  %2177 = vmatpush3.msra.mxu1 %v2847_v25 }
 0x1d8   :  { %698 = vmatprep.subr.mxu0 %v2844_v24  ;;  %2178 = vmatprep.subr.mxu1 %v3650_v33 }
 0x1d9   :  { %699 = vmatpush1.msra.mxu0 %v2850_v26  ;;  %2179 = vmatpush3.msra.mxu1 %v2857_v28 }
 0x1da   :  { %700 = vmatprep.subr.mxu0 %v2854_v27  ;;  %2180 = vmatprep.subr.mxu1 %v3650_v33 }
 0x1db   :  { %701 = vmatpush1.msra.mxu0 %v2860_v29  ;;  %2181 = vmatpush3.msra.mxu1 %v2867_v31 }
 0x1dc   :  { %702 = vmatprep.subr.mxu0 %v2864_v30  ;;  %2182 = vmatprep.subr.mxu1 %v3650_v33 }
 0x1dd   :  { %703 = vmatpush1.msra.mxu0 %v2870_v32  ;;  %2183 = vmatpush3.msra.mxu1 %v2877_v34 }
 0x1de   :  { %704 = vmatprep.subr.mxu0 %v3651_v39  ;;  %2184 = vmatprep.subr.mxu1 %v3650_v33 }
 0x1df   :  { %705 = vmatpush1.msra.mxu0 %v3652_v43  ;;  %2185 = vmatpush3.msra.mxu1 %v3653_v45 }
 0x1e0   :  { %706 = vmatprep.subr.mxu0 %v3654_v47  ;;  %2186 = vmatprep.subr.mxu1 %v3650_v33 }
 0x1e1   :  { %707 = vmatpush1.msra.mxu0 %v3655_v42  ;;  %740 = vmatprep.mubr.f32.mxu0 %v3650_v33 }
 0x1e2   :  { %2187 = vmatpush3.msra.mxu1 %v3656_v44  ;;  %2188 = vmatprep.mubr.msk.f32.mxu1 %vm2660_vm0, %v3650_v33 }
 0x1e3   :  { %853 = vmatprep.subr.mxu0 %v3657_v48  ;;  %2191 = vmatprep.subr.mxu1 %v3650_v33 }
 0x282   :  { %v564_v50 = vpop.f32.mrf.mxu0  ;;  %v635_v54 = vpop.f32.mrf.mxu1 }
 0x283   :  { %v565_v58 = vadd.f32 %v564_v50, %v3658_v1  ;;  %v636_v50 = vadd.f32 %v635_v54, %v2998_v35  ;;  %v3662_v54 = vld [vmem:[#allocation21_spill] sm:$0xff] }
 0x284   :  { %v566_v51 = vpop.f32.mrf.mxu0  ;;  %v2155_v40 = vpop.f32.mrf.mxu1 }
 0x285   :  { %v640_v52 = vrot.slane %v565_v58, 7  ;;  %v567_v38 = vadd.f32 %v566_v51, %v2992_v53  ;;  %v660_v40 = vrot.slane %v636_v50, 7  ;;  %v3665_v50 = vld [vmem:[#allocation23_spill] sm:$0xff] }
 0x287   :  { %v642_v36 = vadd.f32 %v640_v52, %v2986_v46  ;;  %v650_v44 = vrot.slane %v567_v38, 7 }
 0x289   :  { %v1866_v42 = vmul.f32 -1.442695, %v642_v36  ;;  %v652_v47 = vadd.f32 %v650_v44, %v2990_v49  ;;  %v3664_v36 = vld [vmem:[#allocation22_spill] sm:$0xff] }
 0x28b   :  { %2425 = vpow2.f32 %v1866_v42  ;;  %v1867_v45 = vmul.f32 -1.442695, %v652_v47  ;;  %v668_v42 = vrot.slane %v3003_v37, 7  ;;  %v3660_v37 = vld [vmem:[#allocation17_spill] sm:$0xff] }
 0x28d   :  { %2427 = vpow2.f32 %v1867_v45 }
 0x298   :  { %v2426_v48 = vpop.eup %2425 }
 0x299   :  { %v646_v43 = vadd.f32 1.0, %v2426_v48 }
 0x29a   :  { %v2428_v39 = vpop.eup %2427 }
 0x29b   :  { %2429 = vrcp.f32 %v646_v43  ;;  %v656_v1 = vadd.f32 1.0, %v2428_v39  ;;  %v3661_v43 = vld [vmem:[#allocation19_spill] sm:$0xff] }
 0x29d   :  { %2431 = vrcp.f32 %v656_v1  ;;  %v3663_v1 = vld [vmem:[#allocation20_spill] sm:$0xff] }
 0x2a8   :  { %v2430_v58 = vpop.eup %2429 }
 0x2a9   :  { %v662_v34 = vmul.f32 %v2430_v58, %v660_v40  ;;  %v3666_v40 = vld [vmem:[#allocation16_spill] sm:$0xff] }
 0x2aa   :  { %v2432_v52 = vpop.eup %2431 }
 0x2ab   :  { %v663_v51 = vadd.f32 %v662_v34, %v2980_v41  ;;  %v665_v44 = vsub.f32 1.0, %v2432_v52  ;;  %v670_v38 = vmul.f32 %v2432_v52, %v668_v42  ;;  %v3659_v34 = vld [vmem:[#allocation18_spill] sm:$0xff]  ;;  %v3667_v52 = vld [vmem:[#allocation24_spill] sm:$0xff] }
 0x2ad   :  { %2433 = vtanh.f32 %v663_v51 }
 0x2ba   :  { %v2434_v47 = vpop.eup %2433 }
 0x2bb   :  { %v666_v45 = vmul.f32 %v2434_v47, %v665_v44 }
 0x2bd   :  { %v3082_v48 = vadd.f32 %v670_v38, %v666_v45 }
 0x2bf   :  { %672 = vst [vmem:[#allocation2] sm:$0x2] %v3082_v48  ;;  %v674_v39 = vrot.slane %v3082_v48, 1 }
 0x2c1   :  { %741 = vmatmul.mubr.f32.vlgmr.msra.gmra.mxu0 %v674_v39  ;;  %2189 = vmatmul.mubr.f32.vlgmr.msra.gmra.mxu1 %v674_v39 }
 0x2c2   :  { %854 = vmatpush1.msra.mxu0 %v2745_v55  ;;  %2192 = vmatpush3.msra.mxu1 %v2749_v57 }
 0x2c3   :  { %855 = vmatprep.subr.mxu0 %v2747_v56  ;;  %2193 = vmatprep.subr.mxu1 %v3650_v33 }
 0x2c4   :  { %856 = vmatpush1.msra.mxu0 %v2751_v59  ;;  %2194 = vmatpush3.msra.mxu1 %v2757_v61 }
 0x2c5   :  { %857 = vmatprep.subr.mxu0 %v2754_v60  ;;  %2195 = vmatprep.subr.mxu1 %v3650_v33 }
 0x2c6   :  { %858 = vmatpush1.msra.mxu0 %v2760_v62  ;;  %2196 = vmatpush3.msra.mxu1 %v2767_v0 }
 0x2c7   :  { %859 = vmatprep.subr.mxu0 %v2764_v63  ;;  %2197 = vmatprep.subr.mxu1 %v3650_v33 }
 0x2c8   :  { %860 = vmatpush1.msra.mxu0 %v2770_v2  ;;  %2198 = vmatpush3.msra.mxu1 %v2777_v4 }
 0x2c9   :  { %861 = vmatprep.subr.mxu0 %v2774_v3  ;;  %2199 = vmatprep.subr.mxu1 %v3650_v33 }
 0x2ca   :  { %862 = vmatpush1.msra.mxu0 %v2780_v5  ;;  %2200 = vmatpush3.msra.mxu1 %v2787_v7 }
 0x2cb   :  { %863 = vmatprep.subr.mxu0 %v2784_v6  ;;  %2201 = vmatprep.subr.mxu1 %v3650_v33 }
 0x2cc   :  { %864 = vmatpush1.msra.mxu0 %v2790_v8  ;;  %2202 = vmatpush3.msra.mxu1 %v2797_v10 }
 0x2cd   :  { %865 = vmatprep.subr.mxu0 %v2794_v9  ;;  %2203 = vmatprep.subr.mxu1 %v3650_v33 }
 0x2ce   :  { %866 = vmatpush1.msra.mxu0 %v2800_v11  ;;  %2204 = vmatpush3.msra.mxu1 %v2807_v13 }
 0x2cf   :  { %867 = vmatprep.subr.mxu0 %v2804_v12  ;;  %2205 = vmatprep.subr.mxu1 %v3650_v33 }
 0x2d0   :  { %868 = vmatpush1.msra.mxu0 %v2810_v14  ;;  %2206 = vmatpush3.msra.mxu1 %v2817_v16 }
 0x2d1   :  { %869 = vmatprep.subr.mxu0 %v2814_v15  ;;  %2207 = vmatprep.subr.mxu1 %v3650_v33 }
 0x2d2   :  { %870 = vmatpush1.msra.mxu0 %v2820_v17  ;;  %2208 = vmatpush3.msra.mxu1 %v2827_v19 }
 0x2d3   :  { %871 = vmatprep.subr.mxu0 %v2824_v18  ;;  %2209 = vmatprep.subr.mxu1 %v3650_v33 }
 0x2d4   :  { %872 = vmatpush1.msra.mxu0 %v2830_v20  ;;  %2210 = vmatpush3.msra.mxu1 %v2837_v22 }
 0x2d5   :  { %873 = vmatprep.subr.mxu0 %v2834_v21  ;;  %2211 = vmatprep.subr.mxu1 %v3650_v33 }
 0x2d6   :  { %874 = vmatpush1.msra.mxu0 %v2840_v23  ;;  %2212 = vmatpush3.msra.mxu1 %v2847_v25 }
 0x2d7   :  { %875 = vmatprep.subr.mxu0 %v2844_v24  ;;  %2213 = vmatprep.subr.mxu1 %v3650_v33 }
 0x2d8   :  { %876 = vmatpush1.msra.mxu0 %v2850_v26  ;;  %2214 = vmatpush3.msra.mxu1 %v2857_v28 }
 0x2d9   :  { %877 = vmatprep.subr.mxu0 %v2854_v27  ;;  %2215 = vmatprep.subr.mxu1 %v3650_v33 }
 0x2da   :  { %878 = vmatpush1.msra.mxu0 %v2860_v29  ;;  %2216 = vmatpush3.msra.mxu1 %v2867_v31 }
 0x2db   :  { %879 = vmatprep.subr.mxu0 %v2864_v30  ;;  %2217 = vmatprep.subr.mxu1 %v3650_v33 }
 0x2dc   :  { %880 = vmatpush1.msra.mxu0 %v2870_v32  ;;  %2218 = vmatpush3.msra.mxu1 %v3659_v34 }
 0x2dd   :  { %881 = vmatprep.subr.mxu0 %v3660_v37  ;;  %2219 = vmatprep.subr.mxu1 %v3650_v33 }
 0x2de   :  { %882 = vmatpush1.msra.mxu0 %v3661_v43  ;;  %2220 = vmatpush3.msra.mxu1 %v3662_v54 }
 0x2df   :  { %883 = vmatprep.subr.mxu0 %v3663_v1  ;;  %2221 = vmatprep.subr.mxu1 %v3650_v33 }
 0x2e0   :  { %884 = vmatpush1.msra.mxu0 %v3664_v36  ;;  %917 = vmatprep.mubr.f32.mxu0 %v3650_v33 }
 0x2e1   :  { %2222 = vmatpush3.msra.mxu1 %v3665_v50  ;;  %2223 = vmatprep.mubr.msk.f32.mxu1 %vm2660_vm0, %v3650_v33 }
 0x2e2   :  { %1030 = vmatprep.subr.mxu0 %v3666_v40  ;;  %2226 = vmatprep.subr.mxu1 %v3650_v33 }
 0x381   :  { %v742_v58 = vpop.f32.mrf.mxu0  ;;  %v813_v51 = vpop.f32.mrf.mxu1 }
 0x382   :  { %v743_v42 = vadd.f32 %v742_v58, %v3667_v52  ;;  %v814_v58 = vadd.f32 %v813_v51, %v2998_v35 }
 0x383   :  { %v744_v44 = vpop.f32.mrf.mxu0  ;;  %v2190_v47 = vpop.f32.mrf.mxu1 }
 0x384   :  { %v818_v45 = vrot.slane %v743_v42, 6  ;;  %v745_v38 = vadd.f32 %v744_v44, %v2992_v53  ;;  %v838_v47 = vrot.slane %v814_v58, 6 }
 0x386   :  { %v820_v39 = vadd.f32 %v818_v45, %v2986_v46  ;;  %v828_v50 = vrot.slane %v745_v38, 6 }
 0x388   :  { %v1868_v36 = vmul.f32 -1.442695, %v820_v39  ;;  %v830_v1 = vadd.f32 %v828_v50, %v2990_v49  ;;  %v845_v50 = vrot.slane %v3082_v48, 7 }
 0x38a   :  { %2435 = vpow2.f32 %v1868_v36  ;;  %v1869_v54 = vmul.f32 -1.442695, %v830_v1 }
 0x38c   :  { %2437 = vpow2.f32 %v1869_v54 }
 0x397   :  { %v2436_v40 = vpop.eup %2435 }
 0x398   :  { %v824_v43 = vadd.f32 1.0, %v2436_v40 }
 0x399   :  { %v2438_v37 = vpop.eup %2437 }
 0x39a   :  { %2439 = vrcp.f32 %v824_v43  ;;  %v834_v52 = vadd.f32 1.0, %v2438_v37 }
 0x39c   :  { %2441 = vrcp.f32 %v834_v52 }
 0x3a7   :  { %v2440_v42 = vpop.eup %2439 }
 0x3a8   :  { %v840_v34 = vmul.f32 %v2440_v42, %v838_v47 }
 0x3a9   :  { %v2442_v45 = vpop.eup %2441 }
 0x3aa   :  { %v841_v44 = vadd.f32 %v840_v34, %v2980_v41  ;;  %v843_v36 = vsub.f32 1.0, %v2442_v45  ;;  %v847_v38 = vmul.f32 %v2442_v45, %v845_v50  ;;  %v3245_v45 = vld [vmem:[#allocation6 + $0x178] sm:$0xff]  ;;  %v3252_v50 = vld [vmem:[#allocation6 + $0x150] sm:$0xff] }
 0x3ac   :  { %2443 = vtanh.f32 %v841_v44  ;;  %v3242_v44 = vld [vmem:[#allocation6 + $0x168] sm:$0xff] }
 0x3b9   :  { %v2444_v1 = vpop.eup %2443 }
 0x3ba   :  { %v844_v54 = vmul.f32 %v2444_v1, %v843_v36  ;;  %v3248_v36 = vld [vmem:[#allocation6 + $0x158] sm:$0xff]  ;;  %v3255_v1 = vld [vmem:[#allocation6 + $0x160] sm:$0xff] }
 0x3bc   :  { %v3160_v40 = vadd.f32 %v847_v38, %v844_v54  ;;  %v3258_v54 = vld [vmem:[#allocation6 + $0x140] sm:$0xff]  ;;  %v3262_v38 = vld [vmem:[#allocation6 + $0x138] sm:$0xff] }
 0x3be   :  { %849 = vst [vmem:[#allocation2] sm:$0x4] %v3160_v40  ;;  %v851_v37 = vrot.slane %v3160_v40, 2  ;;  %v1022_v51 = vrot.slane %v3160_v40, 7  ;;  %v3265_v40 = vld [vmem:[#allocation6 + $0x148] sm:$0xff] }
 0x3c0   :  { %918 = vmatmul.mubr.f32.vlgmr.msra.gmra.mxu0 %v851_v37  ;;  %2224 = vmatmul.mubr.f32.vlgmr.msra.gmra.mxu1 %v851_v37  ;;  %v3268_v37 = vld [vmem:[#allocation6 + $0x128] sm:$0xff] }
 0x3c1   :  { %1031 = vmatpush1.msra.mxu0 %v2745_v55  ;;  %2227 = vmatpush3.msra.mxu1 %v2749_v57  ;;  %v3668_v55 = vld [vmem:[#allocation18_spill] sm:$0xff]  ;;  %v3670_v57 = vld [vmem:[#allocation19_spill] sm:$0xff] }
 0x3c2   :  { %1032 = vmatprep.subr.mxu0 %v2747_v56  ;;  %2228 = vmatprep.subr.mxu1 %v3650_v33  ;;  %v3669_v56 = vld [vmem:[#allocation17_spill] sm:$0xff] }
 0x3c3   :  { %1033 = vmatpush1.msra.mxu0 %v2751_v59  ;;  %2229 = vmatpush3.msra.mxu1 %v2757_v61  ;;  %v3671_v59 = vld [vmem:[#allocation21_spill] sm:$0xff]  ;;  %v3673_v61 = vld [vmem:[#allocation22_spill] sm:$0xff] }
 0x3c4   :  { %1034 = vmatprep.subr.mxu0 %v2754_v60  ;;  %2230 = vmatprep.subr.mxu1 %v3650_v33  ;;  %v3672_v60 = vld [vmem:[#allocation20_spill] sm:$0xff] }
 0x3c5   :  { %1035 = vmatpush1.msra.mxu0 %v2760_v62  ;;  %2231 = vmatpush3.msra.mxu1 %v2767_v0  ;;  %v3674_v62 = vld [vmem:[#allocation23_spill] sm:$0xff] }
 0x3c6   :  { %1036 = vmatprep.subr.mxu0 %v2764_v63  ;;  %2232 = vmatprep.subr.mxu1 %v3650_v33  ;;  %v3675_v63 = vld [vmem:[#allocation16_spill] sm:$0xff] }
 0x3c7   :  { %1037 = vmatpush1.msra.mxu0 %v2770_v2  ;;  %2233 = vmatpush3.msra.mxu1 %v2777_v4 }
 0x3c8   :  { %1038 = vmatprep.subr.mxu0 %v2774_v3  ;;  %2234 = vmatprep.subr.mxu1 %v3650_v33  ;;  %v3676_v3 = vld [vmem:[#allocation24_spill] sm:$0xff] }
 0x3c9   :  { %1039 = vmatpush1.msra.mxu0 %v2780_v5  ;;  %2235 = vmatpush3.msra.mxu1 %v2787_v7 }
 0x3ca   :  { %1040 = vmatprep.subr.mxu0 %v2784_v6  ;;  %2236 = vmatprep.subr.mxu1 %v3650_v33 }
 0x3cb   :  { %1041 = vmatpush1.msra.mxu0 %v2790_v8  ;;  %2237 = vmatpush3.msra.mxu1 %v2797_v10 }
 0x3cc   :  { %1042 = vmatprep.subr.mxu0 %v2794_v9  ;;  %2238 = vmatprep.subr.mxu1 %v3650_v33 }
 0x3cd   :  { %1043 = vmatpush1.msra.mxu0 %v2800_v11  ;;  %2239 = vmatpush3.msra.mxu1 %v2807_v13 }
 0x3ce   :  { %1044 = vmatprep.subr.mxu0 %v2804_v12  ;;  %2240 = vmatprep.subr.mxu1 %v3650_v33 }
 0x3cf   :  { %1045 = vmatpush1.msra.mxu0 %v2810_v14  ;;  %2241 = vmatpush3.msra.mxu1 %v2817_v16 }
 0x3d0   :  { %1046 = vmatprep.subr.mxu0 %v2814_v15  ;;  %2242 = vmatprep.subr.mxu1 %v3650_v33 }
 0x3d1   :  { %1047 = vmatpush1.msra.mxu0 %v2820_v17  ;;  %2243 = vmatpush3.msra.mxu1 %v2827_v19 }
 0x3d2   :  { %1048 = vmatprep.subr.mxu0 %v2824_v18  ;;  %2244 = vmatprep.subr.mxu1 %v3650_v33 }
 0x3d3   :  { %1049 = vmatpush1.msra.mxu0 %v2830_v20  ;;  %2245 = vmatpush3.msra.mxu1 %v2837_v22 }
 0x3d4   :  { %1050 = vmatprep.subr.mxu0 %v2834_v21  ;;  %2246 = vmatprep.subr.mxu1 %v3650_v33 }
 0x3d5   :  { %1051 = vmatpush1.msra.mxu0 %v2840_v23  ;;  %2247 = vmatpush3.msra.mxu1 %v2847_v25 }
 0x3d6   :  { %1052 = vmatprep.subr.mxu0 %v2844_v24  ;;  %2248 = vmatprep.subr.mxu1 %v3650_v33 }
 0x3d7   :  { %1053 = vmatpush1.msra.mxu0 %v2850_v26  ;;  %2249 = vmatpush3.msra.mxu1 %v2857_v28 }
 0x3d8   :  { %1054 = vmatprep.subr.mxu0 %v2854_v27  ;;  %2250 = vmatprep.subr.mxu1 %v3650_v33 }
 0x3d9   :  { %1055 = vmatpush1.msra.mxu0 %v2860_v29  ;;  %2251 = vmatpush3.msra.mxu1 %v2867_v31 }
 0x3da   :  { %1056 = vmatprep.subr.mxu0 %v2864_v30  ;;  %2252 = vmatprep.subr.mxu1 %v3650_v33 }
 0x3db   :  { %1057 = vmatpush1.msra.mxu0 %v2870_v32  ;;  %2253 = vmatpush3.msra.mxu1 %v3668_v55 }
 0x3dc   :  { %1058 = vmatprep.subr.mxu0 %v3669_v56  ;;  %2254 = vmatprep.subr.mxu1 %v3650_v33 }
 0x3dd   :  { %1059 = vmatpush1.msra.mxu0 %v3670_v57  ;;  %2255 = vmatpush3.msra.mxu1 %v3671_v59 }
 0x3de   :  { %1060 = vmatprep.subr.mxu0 %v3672_v60  ;;  %2256 = vmatprep.subr.mxu1 %v3650_v33 }
 0x3df   :  { %1061 = vmatpush1.msra.mxu0 %v3673_v61  ;;  %1094 = vmatprep.mubr.f32.mxu0 %v3650_v33 }
 0x3e0   :  { %2257 = vmatpush3.msra.mxu1 %v3674_v62  ;;  %2258 = vmatprep.mubr.msk.f32.mxu1 %vm2660_vm0, %v3650_v33 }
 0x3e1   :  { %1207 = vmatprep.subr.mxu0 %v3675_v63  ;;  %2261 = vmatprep.subr.mxu1 %v3650_v33  ;;  %v3272_v63 = vld [vmem:[#allocation6 + $0x120] sm:$0xff] }
 0x480   :  { %v919_v0 = vpop.f32.mrf.mxu0  ;;  %v990_v2 = vpop.f32.mrf.mxu1 }
 0x481   :  { %v920_v4 = vadd.f32 %v919_v0, %v3676_v3  ;;  %v991_v17 = vadd.f32 %v990_v2, %v2998_v35  ;;  %v3275_v0 = vld [vmem:[#allocation6 + $0x130] sm:$0xff] }
 0x482   :  { %v921_v5 = vpop.f32.mrf.mxu0  ;;  %v2225_v6 = vpop.f32.mrf.mxu1  ;;  %v3278_v2 = vld [vmem:[#allocation6 + $0x110] sm:$0xff] }
 0x483   :  { %v995_v7 = vrot.slane %v920_v4, 5  ;;  %v922_v8 = vadd.f32 %v921_v5, %v2992_v53  ;;  %v1015_v19 = vrot.slane %v991_v17, 5  ;;  %v3282_v4 = vld [vmem:[#allocation6 + $0x108] sm:$0xff]  ;;  %v3285_v5 = vld [vmem:[#allocation6 + $0x118] sm:$0xff] }
 0x484   :  { %v3288_v6 = vld [vmem:[#allocation6 + $0xf8] sm:$0xff] }
 0x485   :  { %v997_v9 = vadd.f32 %v995_v7, %v2986_v46  ;;  %v1005_v11 = vrot.slane %v922_v8, 5  ;;  %v3292_v7 = vld [vmem:[#allocation6 + $0xf0] sm:$0xff]  ;;  %v3295_v8 = vld [vmem:[#allocation6 + $0x100] sm:$0xff]  ;;  %v3325_v17 = vld [vmem:[#allocation6 + $0xb8] sm:$0xff] }
 0x487   :  { %v1870_v10 = vmul.f32 -1.442695, %v997_v9  ;;  %v1007_v12 = vadd.f32 %v1005_v11, %v2990_v49  ;;  %v3298_v9 = vld [vmem:[#allocation6 + $0xe0] sm:$0xff]  ;;  %v3305_v11 = vld [vmem:[#allocation6 + $0xe8] sm:$0xff] }
 0x489   :  { %2445 = vpow2.f32 %v1870_v10  ;;  %v1871_v13 = vmul.f32 -1.442695, %v1007_v12  ;;  %v3302_v10 = vld [vmem:[#allocation6 + $0xd8] sm:$0xff]  ;;  %v3308_v12 = vld [vmem:[#allocation6 + $0xc8] sm:$0xff] }
 0x48b   :  { %2447 = vpow2.f32 %v1871_v13  ;;  %v3312_v13 = vld [vmem:[#allocation6 + $0xc0] sm:$0xff] }
 0x496   :  { %v2446_v14 = vpop.eup %2445 }
 0x497   :  { %v1001_v15 = vadd.f32 1.0, %v2446_v14  ;;  %v3315_v14 = vld [vmem:[#allocation6 + $0xd0] sm:$0xff] }
 0x498   :  { %v2448_v16 = vpop.eup %2447 }
 0x499   :  { %2449 = vrcp.f32 %v1001_v15  ;;  %v1011_v18 = vadd.f32 1.0, %v2448_v16  ;;  %v3318_v15 = vld [vmem:[#allocation6 + $0xb0] sm:$0xff]  ;;  %v3322_v16 = vld [vmem:[#allocation6 + $0xa8] sm:$0xff] }
 0x49b   :  { %2451 = vrcp.f32 %v1011_v18  ;;  %v3328_v18 = vld [vmem:[#allocation6 + $0x98] sm:$0xff] }
 0x4a6   :  { %v2450_v20 = vpop.eup %2449 }
 0x4a7   :  { %v1017_v21 = vmul.f32 %v2450_v20, %v1015_v19  ;;  %v3332_v19 = vld [vmem:[#allocation6 + $0x90] sm:$0xff]  ;;  %v3336_v20 = vld [vmem:[#allocation6 + $0x80] sm:$0xff] }
 0x4a8   :  { %v2452_v34 = vpop.eup %2451 }
 0x4a9   :  { %v1018_v48 = vadd.f32 %v1017_v21, %v2980_v41  ;;  %v1020_v43 = vsub.f32 1.0, %v2452_v34  ;;  %v1024_v58 = vmul.f32 %v2452_v34, %v1022_v51 }
 0x4ab   :  { %2453 = vtanh.f32 %v1018_v48 }
 0x4b8   :  { %v2454_v52 = vpop.eup %2453 }
 0x4b9   :  { %v1021_v39 = vmul.f32 %v2454_v52, %v1020_v43 }
 0x4bb   :  { %v3238_v47 = vadd.f32 %v1024_v58, %v1021_v39 }
 0x4bd   :  { %1026 = vst [vmem:[#allocation2] sm:$0x8] %v3238_v47  ;;  %v1028_v42 = vrot.slane %v3238_v47, 3  ;;  %v1199_v39 = vrot.slane %v3238_v47, 7  ;;  %v3417_v47 = vld [vmem:[#allocation6 + $0xa0] sm:$0xff] }
 0x4bf   :  { %1095 = vmatmul.mubr.f32.vlgmr.msra.gmra.mxu0 %v1028_v42  ;;  %2259 = vmatmul.mubr.f32.vlgmr.msra.gmra.mxu1 %v1028_v42 }
 0x4c0   :  { %1208 = vmatpush1.msra.mxu0 %v3242_v44  ;;  %2262 = vmatpush3.msra.mxu1 %v3245_v45 }
 0x4c1   :  { %1209 = vmatprep.subr.mxu0 %v3248_v36  ;;  %2263 = vmatprep.subr.mxu1 %v3650_v33 }
 0x4c2   :  { %1210 = vmatpush1.msra.mxu0 %v3252_v50  ;;  %2264 = vmatpush3.msra.mxu1 %v3255_v1 }
 0x4c3   :  { %1211 = vmatprep.subr.mxu0 %v3258_v54  ;;  %2265 = vmatprep.subr.mxu1 %v3650_v33 }
 0x4c4   :  { %1212 = vmatpush1.msra.mxu0 %v3262_v38  ;;  %2266 = vmatpush3.msra.mxu1 %v3265_v40 }
 0x4c5   :  { %1213 = vmatprep.subr.mxu0 %v3268_v37  ;;  %2267 = vmatprep.subr.mxu1 %v3650_v33 }
 0x4c6   :  { %1214 = vmatpush1.msra.mxu0 %v3272_v63  ;;  %2268 = vmatpush3.msra.mxu1 %v3275_v0 }
 0x4c7   :  { %1215 = vmatprep.subr.mxu0 %v3278_v2  ;;  %2269 = vmatprep.subr.mxu1 %v3650_v33 }
 0x4c8   :  { %1216 = vmatpush1.msra.mxu0 %v3282_v4  ;;  %2270 = vmatpush3.msra.mxu1 %v3285_v5 }
 0x4c9   :  { %1217 = vmatprep.subr.mxu0 %v3288_v6  ;;  %2271 = vmatprep.subr.mxu1 %v3650_v33 }
 0x4ca   :  { %1218 = vmatpush1.msra.mxu0 %v3292_v7  ;;  %2272 = vmatpush3.msra.mxu1 %v3295_v8 }
 0x4cb   :  { %1219 = vmatprep.subr.mxu0 %v3298_v9  ;;  %2273 = vmatprep.subr.mxu1 %v3650_v33 }
 0x4cc   :  { %1220 = vmatpush1.msra.mxu0 %v3302_v10  ;;  %2274 = vmatpush3.msra.mxu1 %v3305_v11 }
 0x4cd   :  { %1221 = vmatprep.subr.mxu0 %v3308_v12  ;;  %2275 = vmatprep.subr.mxu1 %v3650_v33 }
 0x4ce   :  { %1222 = vmatpush1.msra.mxu0 %v3312_v13  ;;  %2276 = vmatpush3.msra.mxu1 %v3315_v14 }
 0x4cf   :  { %1223 = vmatprep.subr.mxu0 %v3318_v15  ;;  %2277 = vmatprep.subr.mxu1 %v3650_v33 }
 0x4d0   :  { %1224 = vmatpush1.msra.mxu0 %v3322_v16  ;;  %2278 = vmatpush3.msra.mxu1 %v3325_v17 }
 0x4d1   :  { %1225 = vmatprep.subr.mxu0 %v3328_v18  ;;  %2279 = vmatprep.subr.mxu1 %v3650_v33 }
 0x4d2   :  { %1226 = vmatpush1.msra.mxu0 %v3332_v19  ;;  %2280 = vmatpush3.msra.mxu1 %v2837_v22  ;;  %v3365_v22 = vld [vmem:[#allocation6 + $0x170] sm:$0xff] }
 0x4d3   :  { %1227 = vmatprep.subr.mxu0 %v3336_v20  ;;  %2281 = vmatprep.subr.mxu1 %v3650_v33 }
 0x4d4   :  { %1228 = vmatpush1.msra.mxu0 %v2840_v23  ;;  %2282 = vmatpush3.msra.mxu1 %v2847_v25 }
 0x4d5   :  { %1229 = vmatprep.subr.mxu0 %v2844_v24  ;;  %2283 = vmatprep.subr.mxu1 %v3650_v33 }
 0x4d6   :  { %1230 = vmatpush1.msra.mxu0 %v2850_v26  ;;  %2284 = vmatpush3.msra.mxu1 %v2857_v28 }
 0x4d7   :  { %1231 = vmatprep.subr.mxu0 %v2854_v27  ;;  %2285 = vmatprep.subr.mxu1 %v3650_v33 }
 0x4d8   :  { %1232 = vmatpush1.msra.mxu0 %v2860_v29  ;;  %2286 = vmatpush3.msra.mxu1 %v2867_v31 }
 0x4d9   :  { %1233 = vmatprep.subr.mxu0 %v2864_v30  ;;  %2287 = vmatprep.subr.mxu1 %v3650_v33 }
 0x4da   :  { %1234 = vmatpush1.msra.mxu0 %v2870_v32  ;;  %2288 = vmatpush3.msra.mxu1 %v3668_v55 }
 0x4db   :  { %1235 = vmatprep.subr.mxu0 %v3669_v56  ;;  %2289 = vmatprep.subr.mxu1 %v3650_v33 }
 0x4dc   :  { %1236 = vmatpush1.msra.mxu0 %v3670_v57  ;;  %2290 = vmatpush3.msra.mxu1 %v3671_v59 }
 0x4dd   :  { %1237 = vmatprep.subr.mxu0 %v3672_v60  ;;  %2291 = vmatprep.subr.mxu1 %v3650_v33 }
 0x4de   :  { %1238 = vmatpush1.msra.mxu0 %v3673_v61  ;;  %1271 = vmatprep.mubr.f32.mxu0 %v3650_v33 }
 0x4df   :  { %2292 = vmatpush3.msra.mxu1 %v3674_v62  ;;  %2293 = vmatprep.mubr.msk.f32.mxu1 %vm2660_vm0, %v3650_v33 }
 0x4e0   :  { %1384 = vmatprep.subr.mxu0 %v3365_v22  ;;  %2296 = vmatprep.subr.mxu1 %v3650_v33 }
 0x57f   :  { %v1096_v23 = vpop.f32.mrf.mxu0  ;;  %v1167_v24 = vpop.f32.mrf.mxu1 }
 0x580   :  { %v1097_v25 = vadd.f32 %v1096_v23, %v3676_v3  ;;  %v1168_v61 = vadd.f32 %v1167_v24, %v2998_v35 }
 0x581   :  { %v1098_v26 = vpop.f32.mrf.mxu0  ;;  %v2260_v27 = vpop.f32.mrf.mxu1 }
 0x582   :  { %v1172_v28 = vrot.slane %v1097_v25, 4  ;;  %v1099_v29 = vadd.f32 %v1098_v26, %v2992_v53  ;;  %v1192_v21 = vrot.slane %v1168_v61, 4  ;;  %v3422_v26 = vld [vmem:[#allocation6 + $0x78] sm:$0xff]  ;;  %v3425_v27 = vld [vmem:[#allocation6 + $0x88] sm:$0xff] }
 0x583   :  { %v3462_v61 = vld [vmem:[#allocation6 + $0x18] sm:$0xff] }
 0x584   :  { %v1174_v30 = vadd.f32 %v1172_v28, %v2986_v46  ;;  %v1182_v32 = vrot.slane %v1099_v29, 4  ;;  %v3428_v28 = vld [vmem:[#allocation6 + $0x68] sm:$0xff]  ;;  %v3432_v29 = vld [vmem:[#allocation6 + $0x60] sm:$0xff]  ;;  %3679 = vst [vmem:[#allocation19_spill] sm:$0xff] %v3462_v61 }
 0x586   :  { %v1872_v31 = vmul.f32 -1.442695, %v1174_v30  ;;  %v1184_v55 = vadd.f32 %v1182_v32, %v2990_v49  ;;  %v3435_v30 = vld [vmem:[#allocation6 + $0x70] sm:$0xff]  ;;  %v3442_v32 = vld [vmem:[#allocation6 + $0x48] sm:$0xff] }
 0x588   :  { %2455 = vpow2.f32 %v1872_v31  ;;  %v1873_v56 = vmul.f32 -1.442695, %v1184_v55  ;;  %v3438_v31 = vld [vmem:[#allocation6 + $0x50] sm:$0xff]  ;;  %v3445_v55 = vld [vmem:[#allocation6 + $0x58] sm:$0xff] }
 0x58a   :  { %2457 = vpow2.f32 %v1873_v56  ;;  %v3448_v56 = vld [vmem:[#allocation6 + $0x38] sm:$0xff] }
 0x595   :  { %v2456_v57 = vpop.eup %2455 }
 0x596   :  { %v1178_v59 = vadd.f32 1.0, %v2456_v57  ;;  %v3452_v57 = vld [vmem:[#allocation6 + $0x30] sm:$0xff] }
 0x597   :  { %v2458_v60 = vpop.eup %2457 }
 0x598   :  { %2459 = vrcp.f32 %v1178_v59  ;;  %v1188_v62 = vadd.f32 1.0, %v2458_v60  ;;  %v3455_v59 = vld [vmem:[#allocation6 + $0x40] sm:$0xff] }
 0x599   :  { %3677 = vst [vmem:[#allocation18_spill] sm:$0xff] %v3455_v59  ;;  %v3458_v60 = vld [vmem:[#allocation6 + $0x20] sm:$0xff] }
 0x59a   :  { %2461 = vrcp.f32 %v1188_v62  ;;  %3678 = vst [vmem:[#allocation17_spill] sm:$0xff] %v3458_v60  ;;  %v3465_v62 = vld [vmem:[#allocation6 + $0x28] sm:$0xff] }
 0x59b   :  { %3680 = vst [vmem:[#allocation21_spill] sm:$0xff] %v3465_v62 }
 0x5a5   :  { %v2460_v48 = vpop.eup %2459 }
 0x5a6   :  { %v1194_v34 = vmul.f32 %v2460_v48, %v1192_v21  ;;  %v3468_v21 = vld [vmem:[#allocation6 + $0x8] sm:$0xff]  ;;  %v3472_v48 = vld [vmem:[#allocation6] sm:$0xff] }
 0x5a7   :  { %v2462_v51 = vpop.eup %2461  ;;  %3681 = vst [vmem:[#allocation20_spill] sm:$0xff] %v3468_v21  ;;  %3682 = vst [vmem:[#allocation22_spill] sm:$0xff] %v3472_v48 }
 0x5a8   :  { %v1195_v43 = vadd.f32 %v1194_v34, %v2980_v41  ;;  %v1197_v52 = vsub.f32 1.0, %v2462_v51  ;;  %v1201_v23 = vmul.f32 %v2462_v51, %v1199_v39  ;;  %v3476_v34 = vld [vmem:[#allocation6 + $0x10] sm:$0xff] }
 0x5a9   :  { %3683 = vst [vmem:[#allocation23_spill] sm:$0xff] %v3476_v34 }
 0x5aa   :  { %2463 = vtanh.f32 %v1195_v43 }
 0x5b7   :  { %v2464_v58 = vpop.eup %2463 }
 0x5b8   :  { %v1198_v42 = vmul.f32 %v2464_v58, %v1197_v52 }
 0x5ba   :  { %v3376_v25 = vadd.f32 %v1201_v23, %v1198_v42 }
 0x5bc   :  { %1203 = vst [vmem:[#allocation2] sm:$0x10] %v3376_v25  ;;  %v1205_v24 = vrot.slane %v3376_v25, 4 }
 0x5be   :  { %1272 = vmatmul.mubr.f32.vlgmr.msra.gmra.mxu0 %v1205_v24  ;;  %2294 = vmatmul.mubr.f32.vlgmr.msra.gmra.mxu1 %v1205_v24 }
 0x5bf   :  { %1385 = vmatpush1.msra.mxu0 %v3242_v44  ;;  %2297 = vmatpush3.msra.mxu1 %v3245_v45 }
 0x5c0   :  { %1386 = vmatprep.subr.mxu0 %v3248_v36  ;;  %2298 = vmatprep.subr.mxu1 %v3650_v33 }
 0x5c1   :  { %1387 = vmatpush1.msra.mxu0 %v3252_v50  ;;  %2299 = vmatpush3.msra.mxu1 %v3255_v1 }
 0x5c2   :  { %1388 = vmatprep.subr.mxu0 %v3258_v54  ;;  %2300 = vmatprep.subr.mxu1 %v3650_v33 }
 0x5c3   :  { %1389 = vmatpush1.msra.mxu0 %v3262_v38  ;;  %2301 = vmatpush3.msra.mxu1 %v3265_v40 }
 0x5c4   :  { %1390 = vmatprep.subr.mxu0 %v3268_v37  ;;  %2302 = vmatprep.subr.mxu1 %v3650_v33 }
 0x5c5   :  { %1391 = vmatpush1.msra.mxu0 %v3272_v63  ;;  %2303 = vmatpush3.msra.mxu1 %v3275_v0 }
 0x5c6   :  { %1392 = vmatprep.subr.mxu0 %v3278_v2  ;;  %2304 = vmatprep.subr.mxu1 %v3650_v33 }
 0x5c7   :  { %1393 = vmatpush1.msra.mxu0 %v3282_v4  ;;  %2305 = vmatpush3.msra.mxu1 %v3285_v5 }
 0x5c8   :  { %1394 = vmatprep.subr.mxu0 %v3288_v6  ;;  %2306 = vmatprep.subr.mxu1 %v3650_v33 }
 0x5c9   :  { %1395 = vmatpush1.msra.mxu0 %v3292_v7  ;;  %2307 = vmatpush3.msra.mxu1 %v3295_v8 }
 0x5ca   :  { %1396 = vmatprep.subr.mxu0 %v3298_v9  ;;  %2308 = vmatprep.subr.mxu1 %v3650_v33 }
 0x5cb   :  { %1397 = vmatpush1.msra.mxu0 %v3302_v10  ;;  %2309 = vmatpush3.msra.mxu1 %v3305_v11 }
 0x5cc   :  { %1398 = vmatprep.subr.mxu0 %v3308_v12  ;;  %2310 = vmatprep.subr.mxu1 %v3650_v33 }
 0x5cd   :  { %1399 = vmatpush1.msra.mxu0 %v3312_v13  ;;  %2311 = vmatpush3.msra.mxu1 %v3315_v14 }
 0x5ce   :  { %1400 = vmatprep.subr.mxu0 %v3318_v15  ;;  %2312 = vmatprep.subr.mxu1 %v3650_v33 }
 0x5cf   :  { %1401 = vmatpush1.msra.mxu0 %v3322_v16  ;;  %2313 = vmatpush3.msra.mxu1 %v3325_v17 }
 0x5d0   :  { %1402 = vmatprep.subr.mxu0 %v3328_v18  ;;  %2314 = vmatprep.subr.mxu1 %v3650_v33 }
 0x5d1   :  { %1403 = vmatpush1.msra.mxu0 %v3332_v19  ;;  %2315 = vmatpush3.msra.mxu1 %v3417_v47 }
 0x5d2   :  { %1404 = vmatprep.subr.mxu0 %v3336_v20  ;;  %2316 = vmatprep.subr.mxu1 %v3650_v33 }
 0x5d3   :  { %1405 = vmatpush1.msra.mxu0 %v3422_v26  ;;  %2317 = vmatpush3.msra.mxu1 %v3425_v27 }
 0x5d4   :  { %1406 = vmatprep.subr.mxu0 %v3428_v28  ;;  %2318 = vmatprep.subr.mxu1 %v3650_v33 }
 0x5d5   :  { %1407 = vmatpush1.msra.mxu0 %v3432_v29  ;;  %2319 = vmatpush3.msra.mxu1 %v3435_v30 }
 0x5d6   :  { %1408 = vmatprep.subr.mxu0 %v3438_v31  ;;  %2320 = vmatprep.subr.mxu1 %v3650_v33 }
 0x5d7   :  { %1409 = vmatpush1.msra.mxu0 %v3442_v32  ;;  %2321 = vmatpush3.msra.mxu1 %v3445_v55 }
 0x5d8   :  { %1410 = vmatprep.subr.mxu0 %v3448_v56  ;;  %2322 = vmatprep.subr.mxu1 %v3650_v33 }
 0x5d9   :  { %1411 = vmatpush1.msra.mxu0 %v3452_v57  ;;  %2323 = vmatpush3.msra.mxu1 %v3455_v59 }
 0x5da   :  { %1412 = vmatprep.subr.mxu0 %v3458_v60  ;;  %2324 = vmatprep.subr.mxu1 %v3650_v33 }
 0x5db   :  { %1413 = vmatpush1.msra.mxu0 %v3462_v61  ;;  %2325 = vmatpush3.msra.mxu1 %v3465_v62 }
 0x5dc   :  { %1414 = vmatprep.subr.mxu0 %v3468_v21  ;;  %2326 = vmatprep.subr.mxu1 %v3650_v33 }
 0x5dd   :  { %1415 = vmatpush1.msra.mxu0 %v3472_v48  ;;  %1448 = vmatprep.mubr.f32.mxu0 %v3650_v33 }
 0x5de   :  { %2327 = vmatpush3.msra.mxu1 %v3476_v34  ;;  %2328 = vmatprep.mubr.msk.f32.mxu1 %vm2660_vm0, %v3650_v33 }
 0x5df   :  { %1561 = vmatprep.subr.mxu0 %v3365_v22  ;;  %2331 = vmatprep.subr.mxu1 %v3650_v33 }
 0x67e   :  { %v1273_v43 = vpop.f32.mrf.mxu0  ;;  %v1344_v51 = vpop.f32.mrf.mxu1 }
 0x67f   :  { %v1274_v52 = vadd.f32 %v1273_v43, %v3676_v3  ;;  %v1345_v43 = vadd.f32 %v1344_v51, %v2998_v35  ;;  %v1745_v51 = vld [vmem:[#allocation8 + $0x40] sm:$0xff] }
 0x680   :  { %v1275_v39 = vpop.f32.mrf.mxu0  ;;  %v2295_v58 = vpop.f32.mrf.mxu1 }
 0x681   :  { %v1349_v42 = vrot.slane %v1274_v52, 3  ;;  %v1276_v23 = vadd.f32 %v1275_v39, %v2992_v53  ;;  %v1369_v58 = vrot.slane %v1345_v43, 3  ;;  %v1743_v43 = vld [vmem:[#allocation8 + $0x30] sm:$0xff] }
 0x683   :  { %v1351_v24 = vadd.f32 %v1349_v42, %v2986_v46  ;;  %v1359_v34 = vrot.slane %v1276_v23, 3 }
 0x685   :  { %v1874_v48 = vmul.f32 -1.442695, %v1351_v24  ;;  %v1361_v21 = vadd.f32 %v1359_v34, %v2990_v49  ;;  %v1376_v34 = vrot.slane %v3376_v25, 7 }
 0x687   :  { %2465 = vpow2.f32 %v1874_v48  ;;  %v1875_v62 = vmul.f32 -1.442695, %v1361_v21 }
 0x689   :  { %2467 = vpow2.f32 %v1875_v62 }
 0x694   :  { %v2466_v22 = vpop.eup %2465 }
 0x695   :  { %v1355_v61 = vadd.f32 1.0, %v2466_v22  ;;  %v1744_v22 = vld [vmem:[#allocation8 + $0x38] sm:$0xff] }
 0x696   :  { %v2468_v60 = vpop.eup %2467 }
 0x697   :  { %2469 = vrcp.f32 %v1355_v61  ;;  %v1365_v3 = vadd.f32 1.0, %v2468_v60  ;;  %v1746_v61 = vld [vmem:[#allocation8 + $0x48] sm:$0xff] }
 0x699   :  { %2471 = vrcp.f32 %v1365_v3  ;;  %v3684_v3 = vld [vmem:[#allocation18_spill] sm:$0xff] }
 0x6a4   :  { %v2470_v52 = vpop.eup %2469 }
 0x6a5   :  { %v1371_v59 = vmul.f32 %v2470_v52, %v1369_v58  ;;  %v1742_v58 = vld [vmem:[#allocation8 + $0x28] sm:$0xff]  ;;  %v1741_v52 = vld [vmem:[#allocation8 + $0x20] sm:$0xff] }
 0x6a6   :  { %v2472_v42 = vpop.eup %2471 }
 0x6a7   :  { %v1372_v39 = vadd.f32 %v1371_v59, %v2980_v41  ;;  %v1374_v48 = vsub.f32 1.0, %v2472_v42  ;;  %v1378_v23 = vmul.f32 %v2472_v42, %v1376_v34  ;;  %v1747_v59 = vld [vmem:[#allocation8 + $0x50] sm:$0xff]  ;;  %v1737_v34 = vld [vmem:[#allocation8] sm:$0xff] }
 0x6a8   :  { %v1739_v42 = vld [vmem:[#allocation8 + $0x10] sm:$0xff] }
 0x6a9   :  { %2473 = vtanh.f32 %v1372_v39  ;;  %v1740_v39 = vld [vmem:[#allocation8 + $0x18] sm:$0xff] }
 0x6b6   :  { %v2474_v21 = vpop.eup %2473 }
 0x6b7   :  { %v1375_v62 = vmul.f32 %v2474_v21, %v1374_v48  ;;  %v1738_v48 = vld [vmem:[#allocation8 + $0x8] sm:$0xff] }
 0x6b9   :  { %v3490_v24 = vadd.f32 %v1378_v23, %v1375_v62 }
 0x6bb   :  { %1380 = vst [vmem:[#allocation2] sm:$0x20] %v3490_v24  ;;  %v1382_v60 = vrot.slane %v3490_v24, 5 }
 0x6bd   :  { %1449 = vmatmul.mubr.f32.vlgmr.msra.gmra.mxu0 %v1382_v60  ;;  %2329 = vmatmul.mubr.f32.vlgmr.msra.gmra.mxu1 %v1382_v60 }
 0x6be   :  { %1562 = vmatpush1.msra.mxu0 %v3242_v44  ;;  %2332 = vmatpush3.msra.mxu1 %v3245_v45  ;;  %v3685_v44 = vld [vmem:[#allocation17_spill] sm:$0xff]  ;;  %v3686_v45 = vld [vmem:[#allocation19_spill] sm:$0xff] }
 0x6bf   :  { %1563 = vmatprep.subr.mxu0 %v3248_v36  ;;  %2333 = vmatprep.subr.mxu1 %v3650_v33  ;;  %v3687_v36 = vld [vmem:[#allocation21_spill] sm:$0xff] }
 0x6c0   :  { %1564 = vmatpush1.msra.mxu0 %v3252_v50  ;;  %2334 = vmatpush3.msra.mxu1 %v3255_v1  ;;  %v3688_v50 = vld [vmem:[#allocation20_spill] sm:$0xff]  ;;  %v3689_v1 = vld [vmem:[#allocation22_spill] sm:$0xff] }
 0x6c1   :  { %1565 = vmatprep.subr.mxu0 %v3258_v54  ;;  %2335 = vmatprep.subr.mxu1 %v3650_v33  ;;  %v3690_v54 = vld [vmem:[#allocation23_spill] sm:$0xff] }
 0x6c2   :  { %1566 = vmatpush1.msra.mxu0 %v3262_v38  ;;  %2336 = vmatpush3.msra.mxu1 %v3265_v40 }
 0x6c3   :  { %1567 = vmatprep.subr.mxu0 %v3268_v37  ;;  %2337 = vmatprep.subr.mxu1 %v3650_v33  ;;  %v3691_v37 = vld [vmem:[#allocation24_spill] sm:$0xff] }
 0x6c4   :  { %1568 = vmatpush1.msra.mxu0 %v3272_v63  ;;  %2338 = vmatpush3.msra.mxu1 %v3275_v0 }
 0x6c5   :  { %1569 = vmatprep.subr.mxu0 %v3278_v2  ;;  %2339 = vmatprep.subr.mxu1 %v3650_v33 }
 0x6c6   :  { %1570 = vmatpush1.msra.mxu0 %v3282_v4  ;;  %2340 = vmatpush3.msra.mxu1 %v3285_v5 }
 0x6c7   :  { %1571 = vmatprep.subr.mxu0 %v3288_v6  ;;  %2341 = vmatprep.subr.mxu1 %v3650_v33 }
 0x6c8   :  { %1572 = vmatpush1.msra.mxu0 %v3292_v7  ;;  %2342 = vmatpush3.msra.mxu1 %v3295_v8 }
 0x6c9   :  { %1573 = vmatprep.subr.mxu0 %v3298_v9  ;;  %2343 = vmatprep.subr.mxu1 %v3650_v33 }
 0x6ca   :  { %1574 = vmatpush1.msra.mxu0 %v3302_v10  ;;  %2344 = vmatpush3.msra.mxu1 %v3305_v11 }
 0x6cb   :  { %1575 = vmatprep.subr.mxu0 %v3308_v12  ;;  %2345 = vmatprep.subr.mxu1 %v3650_v33 }
 0x6cc   :  { %1576 = vmatpush1.msra.mxu0 %v3312_v13  ;;  %2346 = vmatpush3.msra.mxu1 %v3315_v14 }
 0x6cd   :  { %1577 = vmatprep.subr.mxu0 %v3318_v15  ;;  %2347 = vmatprep.subr.mxu1 %v3650_v33 }
 0x6ce   :  { %1578 = vmatpush1.msra.mxu0 %v3322_v16  ;;  %2348 = vmatpush3.msra.mxu1 %v3325_v17 }
 0x6cf   :  { %1579 = vmatprep.subr.mxu0 %v3328_v18  ;;  %2349 = vmatprep.subr.mxu1 %v3650_v33 }
 0x6d0   :  { %1580 = vmatpush1.msra.mxu0 %v3332_v19  ;;  %2350 = vmatpush3.msra.mxu1 %v3417_v47  ;;  %v1553_v47 = vrot.slane %v3490_v24, 7 }
 0x6d1   :  { %1581 = vmatprep.subr.mxu0 %v3336_v20  ;;  %2351 = vmatprep.subr.mxu1 %v3650_v33 }
 0x6d2   :  { %1582 = vmatpush1.msra.mxu0 %v3422_v26  ;;  %2352 = vmatpush3.msra.mxu1 %v3425_v27 }
 0x6d3   :  { %1583 = vmatprep.subr.mxu0 %v3428_v28  ;;  %2353 = vmatprep.subr.mxu1 %v3650_v33 }
 0x6d4   :  { %1584 = vmatpush1.msra.mxu0 %v3432_v29  ;;  %2354 = vmatpush3.msra.mxu1 %v3435_v30 }
 0x6d5   :  { %1585 = vmatprep.subr.mxu0 %v3438_v31  ;;  %2355 = vmatprep.subr.mxu1 %v3650_v33  ;;  %v1752_v31 = vld [vmem:[#allocation8 + $0x78] sm:$0xff] }
 0x6d6   :  { %1586 = vmatpush1.msra.mxu0 %v3442_v32  ;;  %2356 = vmatpush3.msra.mxu1 %v3445_v55  ;;  %v1751_v32 = vld [vmem:[#allocation8 + $0x70] sm:$0xff]  ;;  %v1750_v55 = vld [vmem:[#allocation8 + $0x68] sm:$0xff] }
 0x6d7   :  { %1587 = vmatprep.subr.mxu0 %v3448_v56  ;;  %2357 = vmatprep.subr.mxu1 %v3650_v33  ;;  %v1749_v56 = vld [vmem:[#allocation8 + $0x60] sm:$0xff] }
 0x6d8   :  { %1588 = vmatpush1.msra.mxu0 %v3452_v57  ;;  %2358 = vmatpush3.msra.mxu1 %v3684_v3  ;;  %v1748_v57 = vld [vmem:[#allocation8 + $0x58] sm:$0xff] }
 0x6d9   :  { %1589 = vmatprep.subr.mxu0 %v3685_v44  ;;  %2359 = vmatprep.subr.mxu1 %v3650_v33 }
 0x6da   :  { %1590 = vmatpush1.msra.mxu0 %v3686_v45  ;;  %2360 = vmatpush3.msra.mxu1 %v3687_v36 }
 0x6db   :  { %1591 = vmatprep.subr.mxu0 %v3688_v50  ;;  %2361 = vmatprep.subr.mxu1 %v3650_v33 }
 0x6dc   :  { %1592 = vmatpush1.msra.mxu0 %v3689_v1  ;;  %1625 = vmatprep.mubr.f32.mxu0 %v3650_v33 }
 0x6dd   :  { %2362 = vmatpush3.msra.mxu1 %v3690_v54  ;;  %2363 = vmatprep.mubr.msk.f32.mxu1 %vm2660_vm0, %v3650_v33 }
 0x6de   :  { %2366 = vmatprep.subr.mxu0 %v3650_v33 }
 0x77d   :  { %v1450_v38 = vpop.f32.mrf.mxu0  ;;  %v1521_v40 = vpop.f32.mrf.mxu1 }
 0x77e   :  { %v1451_v63 = vadd.f32 %v1450_v38, %v3691_v37  ;;  %v1522_v14 = vadd.f32 %v1521_v40, %v2998_v35 }
 0x77f   :  { %v1452_v0 = vpop.f32.mrf.mxu0  ;;  %v2330_v2 = vpop.f32.mrf.mxu1 }
 0x780   :  { %v1526_v4 = vrot.slane %v1451_v63, 2  ;;  %v1453_v5 = vadd.f32 %v1452_v0, %v2992_v53  ;;  %v1546_v16 = vrot.slane %v1522_v14, 2 }
 0x782   :  { %v1528_v6 = vadd.f32 %v1526_v4, %v2986_v46  ;;  %v1536_v8 = vrot.slane %v1453_v5, 2 }
 0x784   :  { %v1876_v7 = vmul.f32 -1.442695, %v1528_v6  ;;  %v1538_v9 = vadd.f32 %v1536_v8, %v2990_v49 }
 0x786   :  { %2475 = vpow2.f32 %v1876_v7  ;;  %v1877_v10 = vmul.f32 -1.442695, %v1538_v9 }
 0x788   :  { %2477 = vpow2.f32 %v1877_v10 }
 0x793   :  { %v2476_v11 = vpop.eup %2475 }
 0x794   :  { %v1532_v12 = vadd.f32 1.0, %v2476_v11 }
 0x795   :  { %v2478_v13 = vpop.eup %2477 }
 0x796   :  { %2479 = vrcp.f32 %v1532_v12  ;;  %v1542_v15 = vadd.f32 1.0, %v2478_v13 }
 0x798   :  { %2481 = vrcp.f32 %v1542_v15 }
 0x7a3   :  { %v2480_v17 = vpop.eup %2479 }
 0x7a4   :  { %v1548_v18 = vmul.f32 %v2480_v17, %v1546_v16 }
 0x7a5   :  { %v2482_v20 = vpop.eup %2481 }
 0x7a6   :  { %v1549_v19 = vadd.f32 %v1548_v18, %v2980_v41  ;;  %v1551_v25 = vsub.f32 1.0, %v2482_v20  ;;  %v1555_v28 = vmul.f32 %v2482_v20, %v1553_v47 }
 0x7a8   :  { %2483 = vtanh.f32 %v1549_v19 }
 0x7b5   :  { %v2484_v26 = vpop.eup %2483 }
 0x7b6   :  { %v1552_v27 = vmul.f32 %v2484_v26, %v1551_v25 }
 0x7b8   :  { %v3567_v29 = vadd.f32 %v1555_v28, %v1552_v27 }
 0x7ba   :  { %1557 = vst [vmem:[#allocation2] sm:$0x40] %v3567_v29  ;;  %v1559_v30 = vrot.slane %v3567_v29, 6  ;;  %v1730_v5 = vrot.slane %v3567_v29, 7 }
 0x7bc   :  { %1626 = vmatmul.mubr.f32.vlgmr.msra.gmra.mxu0 %v1559_v30  ;;  %2364 = vmatmul.mubr.f32.vlgmr.msra.gmra.mxu1 %v1559_v30 }
 0x7bd   :  { %2398 = vmatprep.mubr.msk.f32.mxu0 %vm2660_vm0, %v3650_v33  ;;  %2367 = vmatpush3.msra.mxu0 %v1752_v31 }
 0x7be   :  { %2368 = vmatprep.subr.mxu0 %v3650_v33 }
 0x7bf   :  { %2369 = vmatpush3.msra.mxu0 %v1751_v32 }
 0x7c0   :  { %2370 = vmatprep.subr.mxu0 %v3650_v33 }
 0x7c1   :  { %2371 = vmatpush3.msra.mxu0 %v1750_v55 }
 0x7c2   :  { %2372 = vmatprep.subr.mxu0 %v3650_v33 }
 0x7c3   :  { %2373 = vmatpush3.msra.mxu0 %v1749_v56 }
 0x7c4   :  { %2374 = vmatprep.subr.mxu0 %v3650_v33 }
 0x7c5   :  { %2375 = vmatpush3.msra.mxu0 %v1748_v57 }
 0x7c6   :  { %2376 = vmatprep.subr.mxu0 %v3650_v33 }
 0x7c7   :  { %2377 = vmatpush3.msra.mxu0 %v1747_v59 }
 0x7c8   :  { %2378 = vmatprep.subr.mxu0 %v3650_v33 }
 0x7c9   :  { %2379 = vmatpush3.msra.mxu0 %v1746_v61 }
 0x7ca   :  { %2380 = vmatprep.subr.mxu0 %v3650_v33 }
 0x7cb   :  { %2381 = vmatpush3.msra.mxu0 %v1745_v51 }
 0x7cc   :  { %2382 = vmatprep.subr.mxu0 %v3650_v33 }
 0x7cd   :  { %2383 = vmatpush3.msra.mxu0 %v1744_v22 }
 0x7ce   :  { %2384 = vmatprep.subr.mxu0 %v3650_v33 }
 0x7cf   :  { %2385 = vmatpush3.msra.mxu0 %v1743_v43 }
 0x7d0   :  { %2386 = vmatprep.subr.mxu0 %v3650_v33 }
 0x7d1   :  { %2387 = vmatpush3.msra.mxu0 %v1742_v58 }
 0x7d2   :  { %2388 = vmatprep.subr.mxu0 %v3650_v33 }
 0x7d3   :  { %2389 = vmatpush3.msra.mxu0 %v1741_v52 }
 0x7d4   :  { %2390 = vmatprep.subr.mxu0 %v3650_v33 }
 0x7d5   :  { %2391 = vmatpush3.msra.mxu0 %v1740_v39 }
 0x7d6   :  { %2392 = vmatprep.subr.mxu0 %v3650_v33 }
 0x7d7   :  { %2393 = vmatpush3.msra.mxu0 %v1739_v42 }
 0x7d8   :  { %2394 = vmatprep.subr.mxu0 %v3650_v33 }
 0x7d9   :  { %2395 = vmatpush3.msra.mxu0 %v1738_v48 }
 0x7da   :  { %2396 = vmatprep.subr.mxu0 %v3650_v33 }
 0x7db   :  { %2397 = vmatpush3.msra.mxu0 %v1737_v34 }
 0x87c   :  { %v1627_v21 = vpop.f32.mrf.mxu0  ;;  %v1698_v62 = vpop.f32.mrf.mxu1 }
 0x87d   :  { %v1628_v23 = vadd.f32 %v1627_v21, %v3691_v37  ;;  %v1699_v37 = vadd.f32 %v1698_v62, %v2998_v35 }
 0x87e   :  { %v1629_v24 = vpop.f32.mrf.mxu0  ;;  %v2365_v60 = vpop.f32.mrf.mxu1 }
 0x87f   :  { %v1703_v3 = vrot.slane %v1628_v23, 1  ;;  %v1630_v44 = vadd.f32 %v1629_v24, %v2992_v53  ;;  %v1723_v0 = vrot.slane %v1699_v37, 1 }
 0x881   :  { %v1705_v45 = vadd.f32 %v1703_v3, %v2986_v46  ;;  %v1713_v50 = vrot.slane %v1630_v44, 1 }
 0x883   :  { %v1878_v36 = vmul.f32 -1.442695, %v1705_v45  ;;  %v1715_v1 = vadd.f32 %v1713_v50, %v2990_v49 }
 0x885   :  { %2485 = vpow2.f32 %v1878_v36  ;;  %v1879_v54 = vmul.f32 -1.442695, %v1715_v1 }
 0x887   :  { %2487 = vpow2.f32 %v1879_v54 }
 0x892   :  { %v2486_v33 = vpop.eup %2485 }
 0x893   :  { %v1709_v38 = vadd.f32 1.0, %v2486_v33 }
 0x894   :  { %v2488_v40 = vpop.eup %2487 }
 0x895   :  { %2489 = vrcp.f32 %v1709_v38  ;;  %v1719_v63 = vadd.f32 1.0, %v2488_v40 }
 0x897   :  { %2491 = vrcp.f32 %v1719_v63 }
 0x8a2   :  { %v2490_v2 = vpop.eup %2489 }
 0x8a3   :  { %v1725_v4 = vmul.f32 %v2490_v2, %v1723_v0 }
 0x8a4   :  { %v2492_v53 = vpop.eup %2491 }
 0x8a5   :  { %v1726_v46 = vadd.f32 %v1725_v4, %v2980_v41  ;;  %v1728_v49 = vsub.f32 1.0, %v2492_v53  ;;  %v1732_v8 = vmul.f32 %v2492_v53, %v1730_v5 }
 0x8a7   :  { %2493 = vtanh.f32 %v1726_v46 }
 0x8b4   :  { %v2494_v6 = vpop.eup %2493 }
 0x8b5   :  { %v1729_v7 = vmul.f32 %v2494_v6, %v1728_v49 }
 0x8b7   :  { %v1733_v9 = vadd.f32 %v1732_v8, %v1729_v7 }
 0x8b9   :  { %1734 = vst [vmem:[#allocation2] sm:$0x80] %v1733_v9  ;;  %1735 = vst [vmem:[#allocation10 - $0x7] sm:$0x80] %v1733_v9 }
 0x8c0   :  { %v1736_v10 = vld [vmem:[#allocation2] sm:$0xff] }
 0x8c1   :  { %2399 = vmatmul.mubr.f32.vlgmr.msra.gmra.mxu0 %v1736_v10 }
 0x8c2   :  { %2614 = shalt.err (!%p2611_p5)
}
 0x8c3   :  { %1850 = dma.vmem_to_hbm [thread:$0]  %s1848_s25, 16, %s3612_s8, [#allocation11]   ;;  %v1880_v35 = vld [vmem:[%s3609_s5] ss:$0 sm:$0xff] }
 0x8c4   :  { %s2663_s10 = smov [#allocation9]  }
 0x8c5   :  { %s1837_s11 = sshll.u32 %s2663_s10, 4  ;;  %s1838_s11 = int_to_ptr.vmem [resolvable:$true] %s1837_s11 }
 0x8c6   :  { %s2623_s12 = scalar_lea.vmem %s1838_s11, 128  ;;  %p2628_p7 = scmp.lt.s32.totalorder %s1838_s11, %s1838_s11 }
 0x8c7   :  { %p2624_p6 = scmp.ne.s32.totalorder %s1838_s11, %s2623_s12  ;;  %p2629_p8 = scmp.lt.s32.totalorder %s2623_s12, %s2623_s12 }
 0x8c9   :  { %p2630_p9 = por %p2629_p8, %p2628_p7 }
 0x8cb   :  { %p2631_p10 = pnand %p2630_p9, %p2624_p6 }
 0x981   :  { %v1826_v41 = vpop.f32.mrf.mxu0 }
 0x982   :  { %v1827_v11 = vadd.f32 %v1880_v35, %v1826_v41 }
 0x983   :  { %v2400_v12 = vpop.f32.mrf.mxu0 }
 0x984   :  { %1830 = vst [vmem:[#allocation9] sm:$0xff] %v1827_v11 }
 0x985   :  { %2634 = shalt.err (!%p2631_p10)
}
 0x986   :  { %1840 = dma.vmem_to_hbm [thread:$0]  %s1838_s11, 128, %s3611_s7, [#allocation5]  }
 0x987   :  { %2647 = dma.done.wait [#allocation5], 128  }
 0x988   :  { %2648 = vsyncadd [#allocation5], 4294967168 }
 0x989   :  { %2649 = dma.done.wait [#allocation11], 16  }
 0x98a   :  { %2650 = vsyncadd [#allocation11], 4294967280 }
 0x98b   :  { %1857 = vsyncpa [#allocation4], 1 }
 0x98c   :  { %1858 = vsyncpa [#allocation7], 1 }
 0x98d   :  { %1859 = vsyncpa [#allocation5], 1 }
 0x98e   :  { %1860 = vsyncpa [#allocation11], 1 }

</bundles_post_ra>
